<compile_context>
chip_gen: v7x
topology: tpu7x:2x2x1
jax: 0.10.0
libtpu: 0.0.40
codegen_flags: <defaults>
</compile_context>

<pallas_src>
import functools

import jax
import jax.numpy as jnp
from jax.experimental import pallas as pl
from jax.experimental.pallas import tpu as pltpu


def _cdiv(a, b):
    return (a + b - 1) // b


def _round_up(a, b):
    return _cdiv(a, b) * b


def _aspp_kernel(*refs, TH, Wp, W_out, KH, KW, dilation, num_k, has_halo):
    """One (batch, row-tile, Cin-tile) grid step.

    refs (in order):
      x_main : (1, TH*Wp, tCin)        bf16 main row block (flattened H*W)
      x_halo : (1, halo_blk*Wp, tCin)  bf16 halo rows        [only if has_halo]
      w      : (KH*KW, tCin, Cout)     bf16 conv taps
      scale  : (1, Cout)               f32 BN scale = gamma / sqrt(var + eps)
      bias   : (1, Cout)               f32 BN bias  = beta - mean * scale
      out    : (1, TH, W_out, Cout)    f32 output row block
      acc    : (TH, W_out, Cout)       f32 VMEM scratch accumulator
    """
    if has_halo:
        x_main, x_halo, w_ref, scale_ref, bias_ref, out_ref, acc_ref = refs
    else:
        x_main, w_ref, scale_ref, bias_ref, out_ref, acc_ref = refs
        x_halo = None

    k = pl.program_id(2)
    Cout = out_ref.shape[-1]

    @pl.when(k == 0)
    def _init():
        acc_ref[...] = jnp.zeros_like(acc_ref)

    xm = x_main[0]                                   # (TH*Wp, tCin) bf16
    xh = x_halo[0] if has_halo else None             # (halo_blk*Wp, tCin) bf16

    for kh in range(KH):
        r0 = kh * dilation                           # row shift of this tap
        if r0 == 0:
            rows = xm
        else:
            # Output rows [0, TH) need padded-input rows [r0, r0 + TH):
            # tail of the main block + head of the halo block.
            rows = jnp.concatenate([xm[r0 * Wp:], xh[: r0 * Wp]], axis=0)
        for kw in range(KW):
            w_tap = w_ref[kh * KW + kw]              # (tCin, Cout) bf16
            # Full-width matmul (contiguous rows, no strided-window flatten).
            y = jnp.dot(rows, w_tap, preferred_element_type=jnp.float32)
            y = y.reshape(TH, Wp, Cout)
            c0 = kw * dilation                       # column shift of this tap
            acc_ref[...] += y[:, c0:c0 + W_out, :]

    @pl.when(k == num_k - 1)
    def _finish():
        z = acc_ref[...] * scale_ref[0] + bias_ref[0]     # BN affine (f32)
        z = z * jax.nn.sigmoid(z)                         # SiLU       (f32)
        out_ref[0] = z.astype(out_ref.dtype)


def aspp_module_forward(x_nchw, weight_oihw, bn_gamma, bn_beta, bn_mean,
                        bn_var, *, padding, dilation, eps=1e-5):
    """Forward matching _ASPPModule: atrous conv (no bias) -> BN -> SiLU.

    x_nchw      : (N, Cin, H, W) float32
    weight_oihw : (Cout, Cin, KH, KW)  (PyTorch layout)
    Returns     : (N, Cout, H_out, W_out) float32
    """
    N, Cin, H, W = x_nchw.shape
    Cout, _, KH, KW = weight_oihw.shape

    halo_h = dilation * (KH - 1)
    halo_w = dilation * (KW - 1)
    H_out = H + 2 * padding - halo_h
    W_out = W + 2 * padding - halo_w

    # ---- Cin reduction tiling (matters for real ASPP Cin of 256..2048). ----
    if Cin > 512 and Cin % 512 == 0:
        t_cin = 512
    elif Cin > 256 and Cin % 256 == 0:
        t_cin = 256
    else:
        t_cin = Cin
    num_k = Cin // t_cin

    # ---- Spatial tiling: full padded width per block (rounded to 8 sublanes),
    # ---- output rows tiled in blocks of TH plus a small halo block. ----------
    Wp = _round_up(W + 2 * padding, 8)

    def _vmem_estimate(th):
        hb = halo_h if (halo_h > 0 and th % halo_h == 0) else th
        in_b = 2 * (th + (hb if halo_h > 0 else 0)) * Wp * t_cin * 2  # bf16, 2-buf
        w_b = 2 * KH * KW * t_cin * Cout * 2
        out_b = 2 * th * W_out * Cout * 4
        acc_b = th * W_out * Cout * 4
        return in_b + w_b + out_b + acc_b

    VMEM_BUDGET = 16 * 1024 * 1024          # stay well under the 48 MiB limit
    TH = max(8, halo_h)                     # halo rows must fit in one tile
    max_th = max(TH, _cdiv(H_out, 2))       # keep >= 2 row tiles when possible
    while TH * 2 <= max_th and _vmem_estimate(TH * 2) <= VMEM_BUDGET:
        TH *= 2

    num_h = _cdiv(H_out, TH)
    H_out_alloc = num_h * TH
    has_halo = halo_h > 0
    if has_halo:
        halo_blk = halo_h if TH % halo_h == 0 else TH
        hm = TH // halo_blk                 # halo blocks per main block
    else:
        halo_blk = 0
        hm = 1
    Hp_alloc = H_out_alloc + halo_blk

    # ---- Glue: NHWC + bf16 + zero-pad, then flatten (H, W) so the row blocks
    # ---- are plain 2-D (rows, channels) tiles. ------------------------------
    x_nhwc = jnp.transpose(x_nchw, (0, 2, 3, 1)).astype(jnp.bfloat16)
    x_pad = jnp.pad(
        x_nhwc,
        ((0, 0),
         (padding, Hp_alloc - H - padding),
         (padding, Wp - W - padding),
         (0, 0)))
    x_flat = x_pad.reshape(N, Hp_alloc * Wp, Cin)

    w_taps = (jnp.transpose(weight_oihw, (2, 3, 1, 0))
              .reshape(KH * KW, Cin, Cout).astype(jnp.bfloat16))

    scale = (bn_gamma / jnp.sqrt(bn_var + eps)).astype(jnp.float32)
    bias = (bn_beta - bn_mean * scale).astype(jnp.float32)
    scale2d = scale.reshape(1, Cout)
    bias2d = bias.reshape(1, Cout)

    kernel = functools.partial(
        _aspp_kernel, TH=TH, Wp=Wp, W_out=W_out, KH=KH, KW=KW,
        dilation=dilation, num_k=num_k, has_halo=has_halo)

    in_specs = [pl.BlockSpec((1, TH * Wp, t_cin), lambda n, h, k: (n, h, k))]
    args = [x_flat]
    if has_halo:
        in_specs.append(
            pl.BlockSpec((1, halo_blk * Wp, t_cin),
                         lambda n, h, k: (n, (h + 1) * hm, k)))
        args.append(x_flat)
    in_specs += [
        pl.BlockSpec((KH * KW, t_cin, Cout), lambda n, h, k: (0, k, 0)),
        pl.BlockSpec((1, Cout), lambda n, h, k: (0, 0)),
        pl.BlockSpec((1, Cout), lambda n, h, k: (0, 0)),
    ]
    args += [w_taps, scale2d, bias2d]

    out_nhwc = pl.pallas_call(
        kernel,
        out_shape=jax.ShapeDtypeStruct((N, H_out_alloc, W_out, Cout),
                                       jnp.float32),
        grid_spec=pltpu.PrefetchScalarGridSpec(
            num_scalar_prefetch=0,
            grid=(N, num_h, num_k),
            in_specs=in_specs,
            out_specs=pl.BlockSpec((1, TH, W_out, Cout),
                                   lambda n, h, k: (n, h, 0, 0)),
            scratch_shapes=[pltpu.VMEM((TH, W_out, Cout), jnp.float32)]),
        compiler_params=pltpu.CompilerParams(
            dimension_semantics=("parallel", "parallel", "arbitrary"),
            vmem_limit_bytes=48 * 1024 * 1024),
    )(*args)

    out_nhwc = out_nhwc[:, :H_out]                       # drop row-tile padding
    return jnp.transpose(out_nhwc, (0, 3, 1, 2))         # back to NCHW


if __name__ == "__main__":
    # Module config (small, consistent with the ASPP branch pattern).
    inplanes, planes = 4, 8
    kernel_size, padding, dilation = 3, 2, 2   # "same" output size
    N, H, W = 2, 16, 16

    key = jax.random.PRNGKey(0)
    kx, kw = jax.random.split(key)

    x = jax.random.normal(kx, (N, inplanes, H, W), dtype=jnp.float32)

    # Deterministic parameter init mirroring _init_weight():
    #   conv: kaiming_normal_ (fan_in, gain=sqrt(2));  BN: weight=1, bias=0.
    fan_in = inplanes * kernel_size * kernel_size
    std = (2.0 / fan_in) ** 0.5
    weight = std * jax.random.normal(
        kw, (planes, inplanes, kernel_size, kernel_size), dtype=jnp.float32)

    bn_gamma = jnp.ones((planes,), jnp.float32)
    bn_beta = jnp.zeros((planes,), jnp.float32)
    bn_mean = jnp.zeros((planes,), jnp.float32)   # BatchNorm2d running stats
    bn_var = jnp.ones((planes,), jnp.float32)

    out = aspp_module_forward(x, weight, bn_gamma, bn_beta, bn_mean, bn_var,
                              padding=padding, dilation=dilation)
    out = jax.block_until_ready(out)

    # Reference with the same bf16 input/weight quantization + f32 accumulation
    # (the kernel feeds the MXU in bf16, so tolerances are bf16-level).
    x_bf = x.astype(jnp.bfloat16)
    w_bf = weight.astype(jnp.bfloat16)
    ref_conv = jax.lax.conv_general_dilated(
        x_bf, w_bf, window_strides=(1, 1),
        padding=((padding, padding), (padding, padding)),
        rhs_dilation=(dilation, dilation),
        dimension_numbers=("NCHW", "OIHW", "NCHW"),
        preferred_element_type=jnp.float32)
    scale = bn_gamma / jnp.sqrt(bn_var + 1e-5)
    bias = bn_beta - bn_mean * scale
    ref = ref_conv * scale[None, :, None, None] + bias[None, :, None, None]
    ref = ref * jax.nn.sigmoid(ref)

    assert out.shape == (N, planes, H, W), out.shape
    max_err = float(jnp.max(jnp.abs(out - ref)))
    assert jnp.allclose(out, ref, atol=1e-2, rtol=1e-2), max_err

    print("KERNEL_OK")
</pallas_src>

<mosaic_0001>
module attributes {stable_mosaic.version = 11 : i64} {
  func.func @_aspp_kernel(%arg0: i32, %arg1: i32, %arg2: i32, %arg3: memref<1x192x4xbf16, #tpu.memory_space<vmem>>, %arg4: memref<1x96x4xbf16, #tpu.memory_space<vmem>>, %arg5: memref<9x4x8xbf16, #tpu.memory_space<vmem>>, %arg6: memref<1x8xf32, #tpu.memory_space<vmem>>, %arg7: memref<1x8xf32, #tpu.memory_space<vmem>>, %arg8: memref<1x8x16x8xf32, #tpu.memory_space<vmem>>, %arg9: memref<8x16x8xf32, #tpu.memory_space<vmem>>) attributes {dimension_semantics = [#tpu.dimension_semantics<parallel>, #tpu.dimension_semantics<parallel>, #tpu.dimension_semantics<arbitrary>], iteration_bounds = array<i64: 2, 2, 1>, scalar_prefetch = 0 : i64, scratch_operands = 1 : i64, tpu.core_type = #tpu.core_type<tc>, window_params = [{transform_indices = @transform_0, window_bounds = array<i64: 1, 192, 4>}, {transform_indices = @transform_1, window_bounds = array<i64: 1, 96, 4>}, {transform_indices = @transform_2, window_bounds = array<i64: 9, 4, 8>}, {pipeline_mode = #tpu.pipeline_mode<synchronous>, transform_indices = @transform_3, window_bounds = array<i64: 1, 8>}, {pipeline_mode = #tpu.pipeline_mode<synchronous>, transform_indices = @transform_4, window_bounds = array<i64: 1, 8>}, {transform_indices = @transform_5, window_bounds = array<i64: 1, 8, 16, 8>}]} {
    %c0_i32 = arith.constant 0 : i32
    %0 = arith.cmpi eq, %arg2, %c0_i32 : i32
    %1 = arith.extui %0 : i1 to i32
    %c0_i32_0 = arith.constant 0 : i32
    %2 = arith.cmpi ne, %1, %c0_i32_0 : i32
    scf.if %2 {
      %cst_89 = arith.constant 0.000000e+00 : f32
      %87 = vector.broadcast %cst_89 : f32 to vector<8x16x8xf32>
      %c0_90 = arith.constant 0 : index
      %c0_91 = arith.constant 0 : index
      %c0_92 = arith.constant 0 : index
      %88 = vector.load %arg9[%c0_90, %c0_91, %c0_92] : memref<8x16x8xf32, #tpu.memory_space<vmem>>, vector<8x16x8xf32>
      tpu.vector_store %arg9[%c0_90, %c0_91, %c0_92], %87 {strides = array<i32>} : memref<8x16x8xf32, #tpu.memory_space<vmem>>, vector<8x16x8xf32>,
    } else {
    }
    %c0 = arith.constant 0 : index
    %c0_1 = arith.constant 0 : index
    %c0_2 = arith.constant 0 : index
    %3 = vector.load %arg3[%c0, %c0_1, %c0_2] : memref<1x192x4xbf16, #tpu.memory_space<vmem>>, vector<1x192x4xbf16>
    %4 = vector.shape_cast %3 : vector<1x192x4xbf16> to vector<192x4xbf16>
    %c0_3 = arith.constant 0 : index
    %c0_4 = arith.constant 0 : index
    %c0_5 = arith.constant 0 : index
    %5 = vector.load %arg4[%c0_3, %c0_4, %c0_5] : memref<1x96x4xbf16, #tpu.memory_space<vmem>>, vector<1x96x4xbf16>
    %6 = vector.shape_cast %5 : vector<1x96x4xbf16> to vector<96x4xbf16>
    %c0_6 = arith.constant 0 : index
    %c0_7 = arith.constant 0 : index
    %c0_8 = arith.constant 0 : index
    %7 = vector.load %arg5[%c0_6, %c0_7, %c0_8] : memref<9x4x8xbf16, #tpu.memory_space<vmem>>, vector<1x4x8xbf16>
    %8 = vector.shape_cast %7 : vector<1x4x8xbf16> to vector<4x8xbf16>
    %cst = arith.constant dense<0.000000e+00> : vector<192x8xf32>
    %9 = tpu.matmul %4, %8, %cst {dimension_numbers = #tpu.dot_dimension_numbers<[1], [0], [0], [1], [0, 0, 1, 1], [], []>} : vector<192x4xbf16>, vector<4x8xbf16>, vector<192x8xf32> -> vector<192x8xf32>
    %10 = vector.shape_cast %9 : vector<192x8xf32> to vector<8x24x8xf32>
    %c0_9 = arith.constant 0 : index
    %c0_10 = arith.constant 0 : index
    %c0_11 = arith.constant 0 : index
    %11 = vector.load %arg9[%c0_9, %c0_10, %c0_11] : memref<8x16x8xf32, #tpu.memory_space<vmem>>, vector<8x16x8xf32>
    %12 = vector.extract_strided_slice %10 {offsets = [0, 0, 0], sizes = [8, 16, 8], strides = [1, 1, 1]} : vector<8x24x8xf32> to vector<8x16x8xf32>
    %13 = arith.addf %11, %12 : vector<8x16x8xf32>
    %c0_12 = arith.constant 0 : index
    %c0_13 = arith.constant 0 : index
    %c0_14 = arith.constant 0 : index
    %14 = vector.load %arg9[%c0_12, %c0_13, %c0_14] : memref<8x16x8xf32, #tpu.memory_space<vmem>>, vector<8x16x8xf32>
    tpu.vector_store %arg9[%c0_12, %c0_13, %c0_14], %13 {strides = array<i32>} : memref<8x16x8xf32, #tpu.memory_space<vmem>>, vector<8x16x8xf32>,
    %c1 = arith.constant 1 : index
    %c0_15 = arith.constant 0 : index
    %c0_16 = arith.constant 0 : index
    %15 = vector.load %arg5[%c1, %c0_15, %c0_16] : memref<9x4x8xbf16, #tpu.memory_space<vmem>>, vector<1x4x8xbf16>
    %16 = vector.shape_cast %15 : vector<1x4x8xbf16> to vector<4x8xbf16>
    %cst_17 = arith.constant dense<0.000000e+00> : vector<192x8xf32>
    %17 = tpu.matmul %4, %16, %cst_17 {dimension_numbers = #tpu.dot_dimension_numbers<[1], [0], [0], [1], [0, 0, 1, 1], [], []>} : vector<192x4xbf16>, vector<4x8xbf16>, vector<192x8xf32> -> vector<192x8xf32>
    %18 = vector.shape_cast %17 : vector<192x8xf32> to vector<8x24x8xf32>
    %c0_18 = arith.constant 0 : index
    %c0_19 = arith.constant 0 : index
    %c0_20 = arith.constant 0 : index
    %19 = vector.load %arg9[%c0_18, %c0_19, %c0_20] : memref<8x16x8xf32, #tpu.memory_space<vmem>>, vector<8x16x8xf32>
    %20 = vector.extract_strided_slice %18 {offsets = [0, 2, 0], sizes = [8, 16, 8], strides = [1, 1, 1]} : vector<8x24x8xf32> to vector<8x16x8xf32>
    %21 = arith.addf %19, %20 : vector<8x16x8xf32>
    %c0_21 = arith.constant 0 : index
    %c0_22 = arith.constant 0 : index
    %c0_23 = arith.constant 0 : index
    %22 = vector.load %arg9[%c0_21, %c0_22, %c0_23] : memref<8x16x8xf32, #tpu.memory_space<vmem>>, vector<8x16x8xf32>
    tpu.vector_store %arg9[%c0_21, %c0_22, %c0_23], %21 {strides = array<i32>} : memref<8x16x8xf32, #tpu.memory_space<vmem>>, vector<8x16x8xf32>,
    %c2 = arith.constant 2 : index
    %c0_24 = arith.constant 0 : index
    %c0_25 = arith.constant 0 : index
    %23 = vector.load %arg5[%c2, %c0_24, %c0_25] : memref<9x4x8xbf16, #tpu.memory_space<vmem>>, vector<1x4x8xbf16>
    %24 = vector.shape_cast %23 : vector<1x4x8xbf16> to vector<4x8xbf16>
    %cst_26 = arith.constant dense<0.000000e+00> : vector<192x8xf32>
    %25 = tpu.matmul %4, %24, %cst_26 {dimension_numbers = #tpu.dot_dimension_numbers<[1], [0], [0], [1], [0, 0, 1, 1], [], []>} : vector<192x4xbf16>, vector<4x8xbf16>, vector<192x8xf32> -> vector<192x8xf32>
    %26 = vector.shape_cast %25 : vector<192x8xf32> to vector<8x24x8xf32>
    %c0_27 = arith.constant 0 : index
    %c0_28 = arith.constant 0 : index
    %c0_29 = arith.constant 0 : index
    %27 = vector.load %arg9[%c0_27, %c0_28, %c0_29] : memref<8x16x8xf32, #tpu.memory_space<vmem>>, vector<8x16x8xf32>
    %28 = vector.extract_strided_slice %26 {offsets = [0, 4, 0], sizes = [8, 16, 8], strides = [1, 1, 1]} : vector<8x24x8xf32> to vector<8x16x8xf32>
    %29 = arith.addf %27, %28 : vector<8x16x8xf32>
    %c0_30 = arith.constant 0 : index
    %c0_31 = arith.constant 0 : index
    %c0_32 = arith.constant 0 : index
    %30 = vector.load %arg9[%c0_30, %c0_31, %c0_32] : memref<8x16x8xf32, #tpu.memory_space<vmem>>, vector<8x16x8xf32>
    tpu.vector_store %arg9[%c0_30, %c0_31, %c0_32], %29 {strides = array<i32>} : memref<8x16x8xf32, #tpu.memory_space<vmem>>, vector<8x16x8xf32>,
    %31 = vector.extract_strided_slice %4 {offsets = [48, 0], sizes = [144, 4], strides = [1, 1]} : vector<192x4xbf16> to vector<144x4xbf16>
    %32 = vector.extract_strided_slice %6 {offsets = [0, 0], sizes = [48, 4], strides = [1, 1]} : vector<96x4xbf16> to vector<48x4xbf16>
    %33 = tpu.concatenate %31, %32 in 0 : vector<144x4xbf16>, vector<48x4xbf16> -> vector<192x4xbf16>
    %c3 = arith.constant 3 : index
    %c0_33 = arith.constant 0 : index
    %c0_34 = arith.constant 0 : index
    %34 = vector.load %arg5[%c3, %c0_33, %c0_34] : memref<9x4x8xbf16, #tpu.memory_space<vmem>>, vector<1x4x8xbf16>
    %35 = vector.shape_cast %34 : vector<1x4x8xbf16> to vector<4x8xbf16>
    %cst_35 = arith.constant dense<0.000000e+00> : vector<192x8xf32>
    %36 = tpu.matmul %33, %35, %cst_35 {dimension_numbers = #tpu.dot_dimension_numbers<[1], [0], [0], [1], [0, 0, 1, 1], [], []>} : vector<192x4xbf16>, vector<4x8xbf16>, vector<192x8xf32> -> vector<192x8xf32>
    %37 = vector.shape_cast %36 : vector<192x8xf32> to vector<8x24x8xf32>
    %c0_36 = arith.constant 0 : index
    %c0_37 = arith.constant 0 : index
    %c0_38 = arith.constant 0 : index
    %38 = vector.load %arg9[%c0_36, %c0_37, %c0_38] : memref<8x16x8xf32, #tpu.memory_space<vmem>>, vector<8x16x8xf32>
    %39 = vector.extract_strided_slice %37 {offsets = [0, 0, 0], sizes = [8, 16, 8], strides = [1, 1, 1]} : vector<8x24x8xf32> to vector<8x16x8xf32>
    %40 = arith.addf %38, %39 : vector<8x16x8xf32>
    %c0_39 = arith.constant 0 : index
    %c0_40 = arith.constant 0 : index
    %c0_41 = arith.constant 0 : index
    %41 = vector.load %arg9[%c0_39, %c0_40, %c0_41] : memref<8x16x8xf32, #tpu.memory_space<vmem>>, vector<8x16x8xf32>
    tpu.vector_store %arg9[%c0_39, %c0_40, %c0_41], %40 {strides = array<i32>} : memref<8x16x8xf32, #tpu.memory_space<vmem>>, vector<8x16x8xf32>,
    %c4 = arith.constant 4 : index
    %c0_42 = arith.constant 0 : index
    %c0_43 = arith.constant 0 : index
    %42 = vector.load %arg5[%c4, %c0_42, %c0_43] : memref<9x4x8xbf16, #tpu.memory_space<vmem>>, vector<1x4x8xbf16>
    %43 = vector.shape_cast %42 : vector<1x4x8xbf16> to vector<4x8xbf16>
    %cst_44 = arith.constant dense<0.000000e+00> : vector<192x8xf32>
    %44 = tpu.matmul %33, %43, %cst_44 {dimension_numbers = #tpu.dot_dimension_numbers<[1], [0], [0], [1], [0, 0, 1, 1], [], []>} : vector<192x4xbf16>, vector<4x8xbf16>, vector<192x8xf32> -> vector<192x8xf32>
    %45 = vector.shape_cast %44 : vector<192x8xf32> to vector<8x24x8xf32>
    %c0_45 = arith.constant 0 : index
    %c0_46 = arith.constant 0 : index
    %c0_47 = arith.constant 0 : index
    %46 = vector.load %arg9[%c0_45, %c0_46, %c0_47] : memref<8x16x8xf32, #tpu.memory_space<vmem>>, vector<8x16x8xf32>
    %47 = vector.extract_strided_slice %45 {offsets = [0, 2, 0], sizes = [8, 16, 8], strides = [1, 1, 1]} : vector<8x24x8xf32> to vector<8x16x8xf32>
    %48 = arith.addf %46, %47 : vector<8x16x8xf32>
    %c0_48 = arith.constant 0 : index
    %c0_49 = arith.constant 0 : index
    %c0_50 = arith.constant 0 : index
    %49 = vector.load %arg9[%c0_48, %c0_49, %c0_50] : memref<8x16x8xf32, #tpu.memory_space<vmem>>, vector<8x16x8xf32>
    tpu.vector_store %arg9[%c0_48, %c0_49, %c0_50], %48 {strides = array<i32>} : memref<8x16x8xf32, #tpu.memory_space<vmem>>, vector<8x16x8xf32>,
    %c5 = arith.constant 5 : index
    %c0_51 = arith.constant 0 : index
    %c0_52 = arith.constant 0 : index
    %50 = vector.load %arg5[%c5, %c0_51, %c0_52] : memref<9x4x8xbf16, #tpu.memory_space<vmem>>, vector<1x4x8xbf16>
    %51 = vector.shape_cast %50 : vector<1x4x8xbf16> to vector<4x8xbf16>
    %cst_53 = arith.constant dense<0.000000e+00> : vector<192x8xf32>
    %52 = tpu.matmul %33, %51, %cst_53 {dimension_numbers = #tpu.dot_dimension_numbers<[1], [0], [0], [1], [0, 0, 1, 1], [], []>} : vector<192x4xbf16>, vector<4x8xbf16>, vector<192x8xf32> -> vector<192x8xf32>
    %53 = vector.shape_cast %52 : vector<192x8xf32> to vector<8x24x8xf32>
    %c0_54 = arith.constant 0 : index
    %c0_55 = arith.constant 0 : index
    %c0_56 = arith.constant 0 : index
    %54 = vector.load %arg9[%c0_54, %c0_55, %c0_56] : memref<8x16x8xf32, #tpu.memory_space<vmem>>, vector<8x16x8xf32>
    %55 = vector.extract_strided_slice %53 {offsets = [0, 4, 0], sizes = [8, 16, 8], strides = [1, 1, 1]} : vector<8x24x8xf32> to vector<8x16x8xf32>
    %56 = arith.addf %54, %55 : vector<8x16x8xf32>
    %c0_57 = arith.constant 0 : index
    %c0_58 = arith.constant 0 : index
    %c0_59 = arith.constant 0 : index
    %57 = vector.load %arg9[%c0_57, %c0_58, %c0_59] : memref<8x16x8xf32, #tpu.memory_space<vmem>>, vector<8x16x8xf32>
    tpu.vector_store %arg9[%c0_57, %c0_58, %c0_59], %56 {strides = array<i32>} : memref<8x16x8xf32, #tpu.memory_space<vmem>>, vector<8x16x8xf32>,
    %58 = vector.extract_strided_slice %4 {offsets = [96, 0], sizes = [96, 4], strides = [1, 1]} : vector<192x4xbf16> to vector<96x4xbf16>
    %59 = tpu.concatenate %58, %6 in 0 : vector<96x4xbf16>, vector<96x4xbf16> -> vector<192x4xbf16>
    %c6 = arith.constant 6 : index
    %c0_60 = arith.constant 0 : index
    %c0_61 = arith.constant 0 : index
    %60 = vector.load %arg5[%c6, %c0_60, %c0_61] : memref<9x4x8xbf16, #tpu.memory_space<vmem>>, vector<1x4x8xbf16>
    %61 = vector.shape_cast %60 : vector<1x4x8xbf16> to vector<4x8xbf16>
    %cst_62 = arith.constant dense<0.000000e+00> : vector<192x8xf32>
    %62 = tpu.matmul %59, %61, %cst_62 {dimension_numbers = #tpu.dot_dimension_numbers<[1], [0], [0], [1], [0, 0, 1, 1], [], []>} : vector<192x4xbf16>, vector<4x8xbf16>, vector<192x8xf32> -> vector<192x8xf32>
    %63 = vector.shape_cast %62 : vector<192x8xf32> to vector<8x24x8xf32>
    %c0_63 = arith.constant 0 : index
    %c0_64 = arith.constant 0 : index
    %c0_65 = arith.constant 0 : index
    %64 = vector.load %arg9[%c0_63, %c0_64, %c0_65] : memref<8x16x8xf32, #tpu.memory_space<vmem>>, vector<8x16x8xf32>
    %65 = vector.extract_strided_slice %63 {offsets = [0, 0, 0], sizes = [8, 16, 8], strides = [1, 1, 1]} : vector<8x24x8xf32> to vector<8x16x8xf32>
    %66 = arith.addf %64, %65 : vector<8x16x8xf32>
    %c0_66 = arith.constant 0 : index
    %c0_67 = arith.constant 0 : index
    %c0_68 = arith.constant 0 : index
    %67 = vector.load %arg9[%c0_66, %c0_67, %c0_68] : memref<8x16x8xf32, #tpu.memory_space<vmem>>, vector<8x16x8xf32>
    tpu.vector_store %arg9[%c0_66, %c0_67, %c0_68], %66 {strides = array<i32>} : memref<8x16x8xf32, #tpu.memory_space<vmem>>, vector<8x16x8xf32>,
    %c7 = arith.constant 7 : index
    %c0_69 = arith.constant 0 : index
    %c0_70 = arith.constant 0 : index
    %68 = vector.load %arg5[%c7, %c0_69, %c0_70] : memref<9x4x8xbf16, #tpu.memory_space<vmem>>, vector<1x4x8xbf16>
    %69 = vector.shape_cast %68 : vector<1x4x8xbf16> to vector<4x8xbf16>
    %cst_71 = arith.constant dense<0.000000e+00> : vector<192x8xf32>
    %70 = tpu.matmul %59, %69, %cst_71 {dimension_numbers = #tpu.dot_dimension_numbers<[1], [0], [0], [1], [0, 0, 1, 1], [], []>} : vector<192x4xbf16>, vector<4x8xbf16>, vector<192x8xf32> -> vector<192x8xf32>
    %71 = vector.shape_cast %70 : vector<192x8xf32> to vector<8x24x8xf32>
    %c0_72 = arith.constant 0 : index
    %c0_73 = arith.constant 0 : index
    %c0_74 = arith.constant 0 : index
    %72 = vector.load %arg9[%c0_72, %c0_73, %c0_74] : memref<8x16x8xf32, #tpu.memory_space<vmem>>, vector<8x16x8xf32>
    %73 = vector.extract_strided_slice %71 {offsets = [0, 2, 0], sizes = [8, 16, 8], strides = [1, 1, 1]} : vector<8x24x8xf32> to vector<8x16x8xf32>
    %74 = arith.addf %72, %73 : vector<8x16x8xf32>
    %c0_75 = arith.constant 0 : index
    %c0_76 = arith.constant 0 : index
    %c0_77 = arith.constant 0 : index
    %75 = vector.load %arg9[%c0_75, %c0_76, %c0_77] : memref<8x16x8xf32, #tpu.memory_space<vmem>>, vector<8x16x8xf32>
    tpu.vector_store %arg9[%c0_75, %c0_76, %c0_77], %74 {strides = array<i32>} : memref<8x16x8xf32, #tpu.memory_space<vmem>>, vector<8x16x8xf32>,
    %c8 = arith.constant 8 : index
    %c0_78 = arith.constant 0 : index
    %c0_79 = arith.constant 0 : index
    %76 = vector.load %arg5[%c8, %c0_78, %c0_79] : memref<9x4x8xbf16, #tpu.memory_space<vmem>>, vector<1x4x8xbf16>
    %77 = vector.shape_cast %76 : vector<1x4x8xbf16> to vector<4x8xbf16>
    %cst_80 = arith.constant dense<0.000000e+00> : vector<192x8xf32>
    %78 = tpu.matmul %59, %77, %cst_80 {dimension_numbers = #tpu.dot_dimension_numbers<[1], [0], [0], [1], [0, 0, 1, 1], [], []>} : vector<192x4xbf16>, vector<4x8xbf16>, vector<192x8xf32> -> vector<192x8xf32>
    %79 = vector.shape_cast %78 : vector<192x8xf32> to vector<8x24x8xf32>
    %c0_81 = arith.constant 0 : index
    %c0_82 = arith.constant 0 : index
    %c0_83 = arith.constant 0 : index
    %80 = vector.load %arg9[%c0_81, %c0_82, %c0_83] : memref<8x16x8xf32, #tpu.memory_space<vmem>>, vector<8x16x8xf32>
    %81 = vector.extract_strided_slice %79 {offsets = [0, 4, 0], sizes = [8, 16, 8], strides = [1, 1, 1]} : vector<8x24x8xf32> to vector<8x16x8xf32>
    %82 = arith.addf %80, %81 : vector<8x16x8xf32>
    %c0_84 = arith.constant 0 : index
    %c0_85 = arith.constant 0 : index
    %c0_86 = arith.constant 0 : index
    %83 = vector.load %arg9[%c0_84, %c0_85, %c0_86] : memref<8x16x8xf32, #tpu.memory_space<vmem>>, vector<8x16x8xf32>
    tpu.vector_store %arg9[%c0_84, %c0_85, %c0_86], %82 {strides = array<i32>} : memref<8x16x8xf32, #tpu.memory_space<vmem>>, vector<8x16x8xf32>,
    %c0_i32_87 = arith.constant 0 : i32
    %84 = arith.cmpi eq, %arg2, %c0_i32_87 : i32
    %85 = arith.extui %84 : i1 to i32
    %c0_i32_88 = arith.constant 0 : i32
    %86 = arith.cmpi ne, %85, %c0_i32_88 : i32
    scf.if %86 {
      %c0_89 = arith.constant 0 : index
      %c0_90 = arith.constant 0 : index
      %c0_91 = arith.constant 0 : index
      %87 = vector.load %arg9[%c0_89, %c0_90, %c0_91] : memref<8x16x8xf32, #tpu.memory_space<vmem>>, vector<8x16x8xf32>
      %c0_92 = arith.constant 0 : index
      %c0_93 = arith.constant 0 : index
      %88 = vector.load %arg6[%c0_92, %c0_93] : memref<1x8xf32, #tpu.memory_space<vmem>>, vector<1x8xf32>
      %89 = vector.shape_cast %88 : vector<1x8xf32> to vector<8xf32>
      %90 = vector.shape_cast %89 : vector<8xf32> to vector<1x1x8xf32>
      %91 = vector.broadcast %90 : vector<1x1x8xf32> to vector<8x16x8xf32>
      %92 = arith.mulf %87, %91 : vector<8x16x8xf32>
      %c0_94 = arith.constant 0 : index
      %c0_95 = arith.constant 0 : index
      %93 = vector.load %arg7[%c0_94, %c0_95] : memref<1x8xf32, #tpu.memory_space<vmem>>, vector<1x8xf32>
      %94 = vector.shape_cast %93 : vector<1x8xf32> to vector<8xf32>
      %95 = vector.shape_cast %94 : vector<8xf32> to vector<1x1x8xf32>
      %96 = vector.broadcast %95 : vector<1x1x8xf32> to vector<8x16x8xf32>
      %97 = arith.addf %92, %96 : vector<8x16x8xf32>
      %98 = arith.negf %97 : vector<8x16x8xf32>
      %99 = math.exp %98 : vector<8x16x8xf32>
      %cst_96 = arith.constant 1.000000e+00 : f32
      %100 = vector.broadcast %cst_96 : f32 to vector<8x16x8xf32>
      %101 = arith.addf %100, %99 : vector<8x16x8xf32>
      %102 = arith.divf %100, %101 : vector<8x16x8xf32>
      %103 = arith.mulf %97, %102 : vector<8x16x8xf32>
      %c0_97 = arith.constant 0 : index
      %c0_98 = arith.constant 0 : index
      %c0_99 = arith.constant 0 : index
      %c0_100 = arith.constant 0 : index
      %104 = vector.load %arg8[%c0_97, %c0_98, %c0_99, %c0_100] : memref<1x8x16x8xf32, #tpu.memory_space<vmem>>, vector<1x8x16x8xf32>
      %105 = vector.shape_cast %104 : vector<1x8x16x8xf32> to vector<8x16x8xf32>
      %106 = vector.shape_cast %103 : vector<8x16x8xf32> to vector<1x8x16x8xf32>
      tpu.vector_store %arg8[%c0_97, %c0_98, %c0_99, %c0_100], %106 {strides = array<i32>} : memref<1x8x16x8xf32, #tpu.memory_space<vmem>>, vector<1x8x16x8xf32>,
    } else {
    }
    return
  }
  func.func @transform_0(%arg0: i32, %arg1: i32, %arg2: i32) -> (i32, i32, i32) {
    %c0_i32 = arith.constant 0 : i32
    return %arg0, %arg1, %arg2 : i32, i32, i32
  }
  func.func @transform_1(%arg0: i32, %arg1: i32, %arg2: i32) -> (i32, i32, i32) {
    %c1_i32 = arith.constant 1 : i32
    %0 = arith.addi %arg1, %c1_i32 : i32
    %c2_i32 = arith.constant 2 : i32
    %1 = arith.muli %0, %c2_i32 : i32
    %c0_i32 = arith.constant 0 : i32
    return %arg0, %1, %arg2 : i32, i32, i32
  }
  func.func @transform_2(%arg0: i32, %arg1: i32, %arg2: i32) -> (i32, i32, i32) {
    %c0_i32 = arith.constant 0 : i32
    %c0_i32_0 = arith.constant 0 : i32
    %c0_i32_1 = arith.constant 0 : i32
    return %c0_i32, %arg2, %c0_i32_0 : i32, i32, i32
  }
  func.func @transform_3(%arg0: i32, %arg1: i32, %arg2: i32) -> (i32, i32) {
    %c0_i32 = arith.constant 0 : i32
    %c0_i32_0 = arith.constant 0 : i32
    %c0_i32_1 = arith.constant 0 : i32
    return %c0_i32, %c0_i32_0 : i32, i32
  }
  func.func @transform_4(%arg0: i32, %arg1: i32, %arg2: i32) -> (i32, i32) {
    %c0_i32 = arith.constant 0 : i32
    %c0_i32_0 = arith.constant 0 : i32
    %c0_i32_1 = arith.constant 0 : i32
    return %c0_i32, %c0_i32_0 : i32, i32
  }
  func.func @transform_5(%arg0: i32, %arg1: i32, %arg2: i32) -> (i32, i32, i32, i32) {
    %c0_i32 = arith.constant 0 : i32
    %c0_i32_0 = arith.constant 0 : i32
    %c0_i32_1 = arith.constant 0 : i32
    return %arg0, %arg1, %c0_i32, %c0_i32_0 : i32, i32, i32, i32
  }
}

</mosaic_0001>

<bundles_post_ra>
// kernel: tpu_custom_call.1
= control target key start
LH: loop header
LB: loop body
LE: loop exit
PB: predicated region body
PF: predicated region fallthrough
CT: control target
= control target key end

     0   :  { %s3747_s18 = smov 0   ;;  %s3749_s19 = smov 0   ;;  %s4542_s0 = inlined_call_operand.vmem [shape: bf16[2,480,4], index: 0, kind: input, shape index: {}]   ;;  %s4543_s1 = inlined_call_operand.vmem [shape: bf16[2,480,4], index: 1, kind: input, shape index: {}]   ;;  %s4544_s2 = inlined_call_operand.vmem [shape: bf16[9,4,8], index: 2, kind: input, shape index: {}]   ;;  %s4545_s3 = inlined_call_operand.vmem [shape: f32[1,8], index: 3, kind: input, shape index: {}]   ;;  %s4546_s4 = inlined_call_operand.vmem [shape: f32[1,8], index: 4, kind: input, shape index: {}]   ;;  %s4547_s5 = inlined_call_operand.vmem [shape: f32[2,16,16,8], index: 5, kind: output, shape index: {}]  }
   0x1   :  { %s3751_s20 = smov 0   ;;  %s3753_s21 = smov 0  }
   0x2   :  { %s3755_s22 = smov 0  }
   0x3 LB: > { %s30_s23 = sadd.s32 1, %s3706_s20  ;;  %s34_s24 = sadd.s32 1, %s3710_s21  ;;  %s3714_s22 = sphi %s3755_s22, %s15_s22   ;;  %s3710_s21 = sphi %s3753_s21, %s4552_s21   ;;  %s3706_s20 = sphi %s3751_s20, %s4551_s20   ;;  %s3702_s19 = sphi %s3749_s19, %s4550_s19   ;;  %s3698_s18 = sphi %s3747_s18, %s4549_s18  }
   0x4   : > { %p32_p0 = scmp.ge.s32.totalorder %s30_s23, 2  ;;  %p3020_p1 = scmp.ge.s32.totalorder %s3714_s22, 1 }
   0x5   : > { %p267_p2 = scmp.lt.s32.totalorder %s3714_s22, 5 }
   0x6   : > { %s4554_s23 = smov (%p32_p0, %s30_s23), 0  ;;  %s4556_s24 = smov (!%p32_p0, %s34_s24), %s3710_s21 }
   0x7   : > { %p268_p3 = pnand %p3020_p1, %p267_p2  ;;  %p36_p4 = scmp.ge.s32.totalorder %s4556_s24, 2 }
   0x8   : > { %v440_v0 = vld [vmem:[%s4544_s2] sm:$0x3] (!%p268_p3)  ;;  %vm538_vm0 = vcmask (!%p268_p3), 1041408   ;;  %s329_s27 = smul.u32 (!%p268_p3), 24, %s3698_s18  ;;  %p334_p5 = scmp.lt.s32.totalorder (!%p268_p3), %s3702_s19, 1  ;;  %vm501_vm1 = vcmask (!%p268_p3), 31744  }
   0x9   : > { %s4558_s24 = smov (%p36_p4, %s4556_s24), 0  ;;  %271 = sbr.rel (%p268_p3) target bundleno = 505 (0x1f9), region = 40 }
   0xa   : > { %3543 = vmatprep.subr.msk.bf16.mxu1 (!%p268_p3), %vm538_vm0, %v440_v0  ;;  %3542 = vmatprep.subr.msk.bf16.mxu0 (!%p268_p3), %vm538_vm0, %v440_v0  ;;  %v540_v1 = vsel (!%p268_p3), %vm538_vm0, %v440_v0, 0  ;;  %v3053_v2 = vld [vmem:[%s4544_s2 + $0x2] sm:$0x3] (!%p268_p3)  ;;  %v3066_v3 = vld [vmem:[%s4544_s2 + $0x4] sm:$0x3] (!%p268_p3)  ;;  %p336_p6 = scmp.lt.s32.totalorder (!%p268_p3), %s329_s27, 59 }
   0xb   : > { %3541 = vmatpush3.bf16.msra.mxu1 (!%p268_p3), %v540_v1  ;;  %3307 = vmatpush3.bf16.msra.mxu0 (!%p268_p3), %v540_v1  ;;  %s350_s7 = sadd.s32 (!%p268_p3), 1, %s3698_s18  ;;  %v978_v7 = vsel (!%p268_p3), %vm538_vm0, %v3066_v3, 0  ;;  %v3082_v8 = vld [vmem:[%s4544_s2 + $0x6] sm:$0x3] (!%p268_p3)  ;;  %v715_v10 = vsel (!%p268_p3), %vm538_vm0, %v3053_v2, 0  ;;  %vm387_vm2 = vcmask (!%p268_p3), 64512  }
   0xc   : > { %3544 = vmatprep.subr.msk.bf16.mxu1 (!%p268_p3), %vm538_vm0, %v3053_v2  ;;  %3545 = vmatprep.subr.msk.bf16.mxu0 (!%p268_p3), %vm538_vm0, %v3066_v3  ;;  %s3023_s9 = smul.u32 (!%p268_p3), 24, %s350_s7  ;;  %v3095_v11 = vld [vmem:[%s4544_s2 + $0x8] sm:$0x3] (!%p268_p3)  ;;  %v1265_v20 = vsel (!%p268_p3), %vm538_vm0, %v3082_v8, 0  ;;  %v3108_v22 = vld [vmem:[%s4544_s2 + $0xa] sm:$0x3] (!%p268_p3) }
   0xd   : > { %v1439_v21 = vsel (!%p268_p3), %vm538_vm0, %v3095_v11, 0  ;;  %v3124_v23 = vld [vmem:[%s4544_s2 + $0xc] sm:$0x3] (!%p268_p3)  ;;  %v1701_v24 = vsel (!%p268_p3), %vm538_vm0, %v3108_v22, 0  ;;  %v3137_v26 = vld [vmem:[%s4544_s2 + $0xe] sm:$0x3] (!%p268_p3) }
   0xe   : > { %p355_p7 = scmp.lt.s32.totalorder (!%p268_p3), %s3023_s9, 59  ;;  %v1987_v25 = vsel (!%p268_p3), %vm538_vm0, %v3124_v23, 0  ;;  %v3150_v27 = vld [vmem:[%s4544_s2 + $0x10] sm:$0x3] (!%p268_p3)  ;;  %v3716_v28 = vmov (!%p268_p3), 0.0   ;;  %v2161_v32 = vsel (!%p268_p3), %vm538_vm0, %v3137_v26, 0 }
   0xf   : > { %396 = vst.msk [vmem:[#allocation2 + $0x40] sm:$0xff] (!%p268_p3), %vm387_vm2, %v3716_v28  ;;  %388 = vst.msk [vmem:[#allocation2] sm:$0xff] (!%p268_p3), %vm387_vm2, %v3716_v28  ;;  %v2423_v33 = vsel (!%p268_p3), %vm538_vm0, %v3150_v27, 0  ;;  %vm1149_vm3 = vcmask (!%p268_p3), 1043456   ;;  %vm886_vm4 = vcmask (!%p268_p3), 1045504   ;;  %s3025_s25 = sshll.u32 (!%p268_p3), %s3698_s18, 3 }
  0x10   : > { %s4560_s19 = smov (!%p334_p5, %s3702_s19), 1  ;;  %s4562_s27 = smov (!%p336_p6, %s329_s27), 59  ;;  %389 = vst.msk [vmem:[#allocation2 + $0x8] sm:$0xff] %vm387_vm2, %v3716_v28  ;;  %390 = vst.msk [vmem:[#allocation2 + $0x10] sm:$0xff] %vm387_vm2, %v3716_v28 }
  0x11   : > { %s3552_s8 = smul.u32 60, %s4560_s19  ;;  %s4564_s9 = smov (!%p355_p7, %s3023_s9), 59  ;;  %391 = vst.msk [vmem:[#allocation2 + $0x18] sm:$0xff] %vm387_vm2, %v3716_v28  ;;  %392 = vst.msk [vmem:[#allocation2 + $0x20] sm:$0xff] %vm387_vm2, %v3716_v28 }
  0x12   : > { %393 = vst.msk [vmem:[#allocation2 + $0x28] sm:$0xff] %vm387_vm2, %v3716_v28  ;;  %394 = vst.msk [vmem:[#allocation2 + $0x30] sm:$0xff] %vm387_vm2, %v3716_v28  ;;  %p4382_p8 = scmp.lt.s32.totalorder %s3025_s25, 15 }
  0x13   : > { %s342_s10 = sadd.s32 %s3552_s8, %s4562_s27  ;;  %s361_s26 = sadd.s32 %s3552_s8, %s4564_s9  ;;  %395 = vst.msk [vmem:[#allocation2 + $0x38] sm:$0xff] %vm387_vm2, %v3716_v28  ;;  %397 = vst.msk [vmem:[#allocation2 + $0x48] sm:$0xff] %vm387_vm2, %v3716_v28 }
  0x14   : > { %s3021_s11 = sshll.u32 %s342_s10, 2  ;;  %s3024_s27 = sshll.u32 %s361_s26, 2  ;;  %398 = vst.msk [vmem:[#allocation2 + $0x50] sm:$0xff] %vm387_vm2, %v3716_v28  ;;  %399 = vst.msk [vmem:[#allocation2 + $0x58] sm:$0xff] %vm387_vm2, %v3716_v28 }
  0x15   : > { %s3801_s14 = scalar_lea.vmem %s4542_s0, %s3021_s11  ;;  %s3849_s30 = scalar_lea.vmem %s4543_s1, %s3024_s27  ;;  %400 = vst.msk [vmem:[#allocation2 + $0x60] sm:$0xff] %vm387_vm2, %v3716_v28  ;;  %401 = vst.msk [vmem:[#allocation2 + $0x68] sm:$0xff] %vm387_vm2, %v3716_v28 }
  0x16   : > { %v3594_v4 = vld [vmem:[%s3801_s14] sm:$0xff]   ;;  %v3805_v5 = vld [vmem:[%s3801_s14 + $0x30] sm:$0xff]   ;;  %v3596_v6 = vld [vmem:[%s3801_s14 + $0x8] sm:$0xff]   ;;  %402 = vst.msk [vmem:[#allocation2 + $0x70] sm:$0xff] %vm387_vm2, %v3716_v28  ;;  %s4566_s25 = smov (!%p4382_p8, %s3025_s25), 15  ;;  %s3027_s27 = sshll.u32 %s4560_s19, 5 }
  0x17   : > { %3308 = vmatprep.mubr.msk.bf16.mxu0 %vm501_vm1, %v3594_v4  ;;  %3320 = vmatprep.mubr.msk.bf16.mxu1 %vm501_vm1, %v3805_v5  ;;  %v3816_v9 = vld [vmem:[%s3801_s14 + $0x38] sm:$0xff]   ;;  %v3598_v12 = vld [vmem:[%s3801_s14 + $0x10] sm:$0xff]   ;;  %v3827_v13 = vld [vmem:[%s3801_s14 + $0x40] sm:$0xff]   ;;  %403 = vst.msk [vmem:[#allocation2 + $0x78] sm:$0xff] %vm387_vm2, %v3716_v28  ;;  %s3026_s18 = sshll.u32 %s4566_s25, 1 }
  0x18   : > { %3309 = vmatmul.mubr.msk.bf16.vlgmr.msra.gmra.mrb[0].mxu0 %vm501_vm1, %v3596_v6  ;;  %3321 = vmatmul.mubr.msk.bf16.vlgmr.msra.gmra.mrb[0].mxu1 %vm501_vm1, %v3816_v9  ;;  %v3833_v14 = vld [vmem:[%s3801_s14 + $0x18] sm:$0xff]   ;;  %v3837_v15 = vld [vmem:[%s3801_s14 + $0x48] sm:$0xff]   ;;  %v3841_v16 = vld [vmem:[%s3801_s14 + $0x20] sm:$0xff]   ;;  %s378_s19 = sadd.s32 %s3027_s27, %s3026_s18 }
  0x19   : > { %3359 = vmatpush3.bf16.msra.mxu0 %v978_v7  ;;  %3333 = vmatpush3.bf16.msra.mxu1 %v715_v10  ;;  %v3844_v17 = vld [vmem:[%s3801_s14 + $0x50] sm:$0xff]   ;;  %v3860_v18 = vld [vmem:[%s3801_s14 + $0x28] sm:$0xff]   ;;  %v3863_v19 = vld [vmem:[%s3801_s14 + $0x58] sm:$0xff]   ;;  %s3028_s28 = sshll.u32 %s378_s19, 3 }
  0x1a   : > { %3312 = vmatprep.mubr.msk.bf16.mxu0 %vm501_vm1, %v3598_v12  ;;  %3324 = vmatprep.mubr.msk.bf16.mxu1 %vm501_vm1, %v3827_v13  ;;  %v3606_v29 = vld [vmem:[%s3849_s30] sm:$0xff]   ;;  %v3607_v30 = vld [vmem:[%s3849_s30 + $0x8] sm:$0xff]   ;;  %v3608_v31 = vld [vmem:[%s3849_s30 + $0x10] sm:$0xff]   ;;  %s4455_s6 = scalar_lea.vmem %s4547_s5, %s3028_s28 }
  0x1b   : > { %3546 = vmatprep.subr.msk.bf16.mxu1 %vm538_vm0, %v3082_v8  ;;  %3547 = vmatprep.subr.msk.bf16.mxu0 %vm538_vm0, %v3095_v11  ;;  %v3609_v34 = vld [vmem:[%s3849_s30 + $0x18] sm:$0xff]   ;;  %v3610_v35 = vld [vmem:[%s3849_s30 + $0x20] sm:$0xff]   ;;  %v3611_v36 = vld [vmem:[%s3849_s30 + $0x28] sm:$0xff]  }
  0x1c   : > { %v663_v37 = vld [vmem:[#allocation2] sm:$0xff]  ;;  %v665_v40 = vld [vmem:[#allocation2 + $0x10] sm:$0xff]  ;;  %v664_v44 = vld [vmem:[#allocation2 + $0x8] sm:$0xff] }
  0x1d   : > { %v671_v38 = vld [vmem:[#allocation2 + $0x40] sm:$0xff]  ;;  %v673_v42 = vld [vmem:[#allocation2 + $0x50] sm:$0xff]  ;;  %v672_v46 = vld [vmem:[#allocation2 + $0x48] sm:$0xff] }
  0x1e   : > { %v667_v57 = vld [vmem:[#allocation2 + $0x20] sm:$0xff]  ;;  %v666_v59 = vld [vmem:[#allocation2 + $0x18] sm:$0xff]  ;;  %v668_v62 = vld [vmem:[#allocation2 + $0x28] sm:$0xff] }
  0x1f   : > { %v675_v58 = vld [vmem:[#allocation2 + $0x60] sm:$0xff]  ;;  %v674_v60 = vld [vmem:[#allocation2 + $0x58] sm:$0xff]  ;;  %v676_v0 = vld [vmem:[#allocation2 + $0x68] sm:$0xff] }
  0x20   : > { %3313 = vmatmul.mubr.msk.bf16.gmra.mrb[4].mxu0 %vm501_vm1, %v3833_v14  ;;  %3325 = vmatmul.mubr.msk.bf16.gmra.mrb[4].mxu1 %vm501_vm1, %v3837_v15 }
  0x21   : > { %3316 = vmatprep.mubr.msk.bf16.mxu0 %vm501_vm1, %v3841_v16  ;;  %3328 = vmatprep.mubr.msk.bf16.mxu1 %vm501_vm1, %v3844_v17 }
  0x28   : > { %3317 = vmatmul.mubr.msk.bf16.gmra.mrb[8].mxu0 %vm501_vm1, %v3860_v18  ;;  %3329 = vmatmul.mubr.msk.bf16.gmra.mrb[8].mxu1 %vm501_vm1, %v3863_v19 }
  0x29   : > { %3360 = vmatprep.mubr.msk.bf16.mxu0 %vm501_vm1, %v3594_v4  ;;  %3334 = vmatprep.mubr.msk.bf16.mxu1 %vm501_vm1, %v3594_v4 }
  0x30   : > { %3361 = vmatmul.mubr.msk.bf16.vlgmr.msra.gmra.mrb[12].mxu0 %vm501_vm1, %v3596_v6  ;;  %3335 = vmatmul.mubr.msk.bf16.vlgmr.msra.gmra.mrb[12].mxu1 %vm501_vm1, %v3596_v6 }
  0x31   : > { %3364 = vmatprep.mubr.msk.bf16.mxu0 %vm501_vm1, %v3598_v12  ;;  %3385 = vmatpush3.bf16.msra.mxu1 %v1265_v20 }
  0x32   : > { %3338 = vmatprep.mubr.msk.bf16.mxu1 %vm501_vm1, %v3598_v12  ;;  %3411 = vmatpush3.bf16.msra.mxu0 %v1439_v21 }
  0x33   : > { %3548 = vmatprep.subr.msk.bf16.mxu1 %vm538_vm0, %v3108_v22  ;;  %3549 = vmatprep.subr.msk.bf16.mxu0 %vm538_vm0, %v3124_v23  ;;  %v677_v22 = vld [vmem:[#allocation2 + $0x70] sm:$0xff] }
  0x38   : > { %3365 = vmatmul.mubr.msk.bf16.gmra.mrb[16].mxu0 %vm501_vm1, %v3833_v14  ;;  %3339 = vmatmul.mubr.msk.bf16.gmra.mrb[16].mxu1 %vm501_vm1, %v3833_v14 }
  0x39   : > { %3368 = vmatprep.mubr.msk.bf16.mxu0 %vm501_vm1, %v3841_v16  ;;  %3342 = vmatprep.mubr.msk.bf16.mxu1 %vm501_vm1, %v3841_v16 }
  0x40   : > { %3369 = vmatmul.mubr.msk.bf16.gmra.mrb[20].mxu0 %vm501_vm1, %v3860_v18  ;;  %3343 = vmatmul.mubr.msk.bf16.gmra.mrb[20].mxu1 %vm501_vm1, %v3860_v18 }
  0x41   : > { %3372 = vmatprep.mubr.msk.bf16.mxu0 %vm501_vm1, %v3805_v5  ;;  %3346 = vmatprep.mubr.msk.bf16.mxu1 %vm501_vm1, %v3805_v5 }
  0x48   : > { %3373 = vmatmul.mubr.msk.bf16.gmra.mrb[24].mxu0 %vm501_vm1, %v3816_v9  ;;  %3347 = vmatmul.mubr.msk.bf16.gmra.mrb[24].mxu1 %vm501_vm1, %v3816_v9 }
  0x49   : > { %3376 = vmatprep.mubr.msk.bf16.mxu0 %vm501_vm1, %v3827_v13  ;;  %3350 = vmatprep.mubr.msk.bf16.mxu1 %vm501_vm1, %v3827_v13 }
  0x50   : > { %3377 = vmatmul.mubr.msk.bf16.gmra.mrb[28].mxu0 %vm501_vm1, %v3837_v15  ;;  %3351 = vmatmul.mubr.msk.bf16.gmra.mrb[28].mxu1 %vm501_vm1, %v3837_v15 }
  0x51   : > { %3380 = vmatprep.mubr.msk.bf16.mxu0 %vm501_vm1, %v3844_v17  ;;  %3354 = vmatprep.mubr.msk.bf16.mxu1 %vm501_vm1, %v3844_v17 }
  0x58   : > { %3381 = vmatmul.mubr.msk.bf16.gmra.mrb[32].mxu0 %vm501_vm1, %v3863_v19  ;;  %3355 = vmatmul.mubr.msk.bf16.gmra.mrb[32].mxu1 %vm501_vm1, %v3863_v19 }
  0x59   : > { %3412 = vmatprep.mubr.msk.bf16.mxu0 %vm501_vm1, %v3833_v14  ;;  %3386 = vmatprep.mubr.msk.bf16.mxu1 %vm501_vm1, %v3833_v14 }
  0x60   : > { %3413 = vmatmul.mubr.msk.bf16.vlgmr.msra.gmra.mrb[36].mxu0 %vm501_vm1, %v3841_v16  ;;  %3387 = vmatmul.mubr.msk.bf16.vlgmr.msra.gmra.mrb[36].mxu1 %vm501_vm1, %v3841_v16 }
  0x61   : > { %3416 = vmatprep.mubr.msk.bf16.mxu0 %vm501_vm1, %v3860_v18  ;;  %3437 = vmatpush3.bf16.msra.mxu1 %v1701_v24 }
  0x62   : > { %3390 = vmatprep.mubr.msk.bf16.mxu1 %vm501_vm1, %v3860_v18  ;;  %3463 = vmatpush3.bf16.msra.mxu0 %v1987_v25 }
  0x63   : > { %3550 = vmatprep.subr.msk.bf16.mxu1 %vm538_vm0, %v3137_v26  ;;  %3551 = vmatprep.subr.msk.bf16.mxu0 %vm538_vm0, %v3150_v27 }
  0x68   : > { %3417 = vmatmul.mubr.msk.bf16.gmra.mrb[40].mxu0 %vm501_vm1, %v3805_v5  ;;  %3391 = vmatmul.mubr.msk.bf16.gmra.mrb[40].mxu1 %vm501_vm1, %v3805_v5 }
  0x69   : > { %3420 = vmatprep.mubr.msk.bf16.mxu0 %vm501_vm1, %v3816_v9  ;;  %3394 = vmatprep.mubr.msk.bf16.mxu1 %vm501_vm1, %v3816_v9 }
  0x70   : > { %3421 = vmatmul.mubr.msk.bf16.gmra.mrb[44].mxu0 %vm501_vm1, %v3827_v13  ;;  %3395 = vmatmul.mubr.msk.bf16.gmra.mrb[44].mxu1 %vm501_vm1, %v3827_v13 }
  0x71   : > { %3424 = vmatprep.mubr.msk.bf16.mxu0 %vm501_vm1, %v3837_v15  ;;  %3398 = vmatprep.mubr.msk.bf16.mxu1 %vm501_vm1, %v3837_v15 }
  0x78   : > { %3425 = vmatmul.mubr.msk.bf16.gmra.mrb[48].mxu0 %vm501_vm1, %v3844_v17  ;;  %3399 = vmatmul.mubr.msk.bf16.gmra.mrb[48].mxu1 %vm501_vm1, %v3844_v17 }
  0x79   : > { %3428 = vmatprep.mubr.msk.bf16.mxu0 %vm501_vm1, %v3863_v19  ;;  %3402 = vmatprep.mubr.msk.bf16.mxu1 %vm501_vm1, %v3863_v19 }
  0x80   : > { %3429 = vmatmul.mubr.msk.bf16.gmra.mrb[52].mxu0 %vm501_vm1, %v3606_v29  ;;  %3403 = vmatmul.mubr.msk.bf16.gmra.mrb[52].mxu1 %vm501_vm1, %v3606_v29 }
  0x81   : > { %3432 = vmatprep.mubr.msk.bf16.mxu0 %vm501_vm1, %v3607_v30  ;;  %3406 = vmatprep.mubr.msk.bf16.mxu1 %vm501_vm1, %v3607_v30 }
  0x88   : > { %3433 = vmatmul.mubr.msk.bf16.gmra.mrb[56].mxu0 %vm501_vm1, %v3608_v31  ;;  %3407 = vmatmul.mubr.msk.bf16.gmra.mrb[56].mxu1 %vm501_vm1, %v3608_v31 }
  0x89   : > { %3464 = vmatprep.mubr.msk.bf16.mxu0 %vm501_vm1, %v3805_v5  ;;  %3438 = vmatprep.mubr.msk.bf16.mxu1 %vm501_vm1, %v3833_v14  ;;  %v678_v14 = vld [vmem:[#allocation2 + $0x78] sm:$0xff] }
  0x90   : > { %3465 = vmatmul.mubr.msk.bf16.vlgmr.msra.gmra.mrb[60].mxu0 %vm501_vm1, %v3816_v9  ;;  %3439 = vmatmul.mubr.msk.bf16.vlgmr.msra.gmra.mrb[60].mxu1 %vm501_vm1, %v3841_v16 }
  0x91   : > { %3468 = vmatprep.mubr.msk.bf16.mxu0 %vm501_vm1, %v3827_v13  ;;  %3489 = vmatpush3.bf16.msra.mxu1 %v2161_v32 }
  0x92   : > { %3442 = vmatprep.mubr.msk.bf16.mxu1 %vm501_vm1, %v3860_v18  ;;  %3515 = vmatpush3.bf16.msra.mxu0 %v2423_v33 }
  0x98   : > { %3469 = vmatmul.mubr.msk.bf16.gmra.mrb[64].mxu0 %vm501_vm1, %v3837_v15  ;;  %3443 = vmatmul.mubr.msk.bf16.gmra.mrb[64].mxu1 %vm501_vm1, %v3805_v5 }
  0x99   : > { %3472 = vmatprep.mubr.msk.bf16.mxu0 %vm501_vm1, %v3844_v17  ;;  %3446 = vmatprep.mubr.msk.bf16.mxu1 %vm501_vm1, %v3816_v9 }
  0xa0   : > { %3473 = vmatmul.mubr.msk.bf16.gmra.mrb[68].mxu0 %vm501_vm1, %v3863_v19  ;;  %3447 = vmatmul.mubr.msk.bf16.gmra.mrb[68].mxu1 %vm501_vm1, %v3827_v13 }
  0xa1   : > { %3476 = vmatprep.mubr.msk.bf16.mxu0 %vm501_vm1, %v3606_v29  ;;  %3450 = vmatprep.mubr.msk.bf16.mxu1 %vm501_vm1, %v3837_v15 }
  0xa8   : > { %3477 = vmatmul.mubr.msk.bf16.gmra.mrb[72].mxu0 %vm501_vm1, %v3607_v30  ;;  %3451 = vmatmul.mubr.msk.bf16.gmra.mrb[72].mxu1 %vm501_vm1, %v3844_v17 }
  0xa9   : > { %3480 = vmatprep.mubr.msk.bf16.mxu0 %vm501_vm1, %v3608_v31  ;;  %3454 = vmatprep.mubr.msk.bf16.mxu1 %vm501_vm1, %v3863_v19 }
  0xb0   : > { %3481 = vmatmul.mubr.msk.bf16.gmra.mrb[76].mxu0 %vm501_vm1, %v3609_v34  ;;  %3455 = vmatmul.mubr.msk.bf16.gmra.mrb[76].mxu1 %vm501_vm1, %v3606_v29 }
  0xb1   : > { %3484 = vmatprep.mubr.msk.bf16.mxu0 %vm501_vm1, %v3610_v35  ;;  %3458 = vmatprep.mubr.msk.bf16.mxu1 %vm501_vm1, %v3607_v30 }
  0xb8   : > { %3485 = vmatmul.mubr.msk.bf16.gmra.mrb[80].mxu0 %vm501_vm1, %v3611_v36  ;;  %3459 = vmatmul.mubr.msk.bf16.gmra.mrb[80].mxu1 %vm501_vm1, %v3608_v31 }
  0xb9   : > { %3516 = vmatprep.mubr.msk.bf16.mxu0 %vm501_vm1, %v3805_v5  ;;  %3490 = vmatprep.mubr.msk.bf16.mxu1 %vm501_vm1, %v3805_v5 }
  0xc0   : > { %3517 = vmatmul.mubr.msk.bf16.vlgmr.msra.gmra.mrb[84].mxu0 %vm501_vm1, %v3816_v9  ;;  %3491 = vmatmul.mubr.msk.bf16.vlgmr.msra.gmra.mrb[84].mxu1 %vm501_vm1, %v3816_v9 }
  0xc1   : > { %3520 = vmatprep.mubr.msk.bf16.mxu0 %vm501_vm1, %v3827_v13  ;;  %3494 = vmatprep.mubr.msk.bf16.mxu1 %vm501_vm1, %v3827_v13  ;;  %v670_v13 = vld [vmem:[#allocation2 + $0x38] sm:$0xff] }
  0xc8   : > { %3521 = vmatmul.mubr.msk.bf16.gmra.mrb[88].mxu0 %vm501_vm1, %v3837_v15  ;;  %3495 = vmatmul.mubr.msk.bf16.gmra.mrb[88].mxu1 %vm501_vm1, %v3837_v15 }
  0xc9   : > { %3524 = vmatprep.mubr.msk.bf16.mxu0 %vm501_vm1, %v3844_v17  ;;  %3498 = vmatprep.mubr.msk.bf16.mxu1 %vm501_vm1, %v3844_v17 }
  0xd0   : > { %3525 = vmatmul.mubr.msk.bf16.gmra.mrb[92].mxu0 %vm501_vm1, %v3863_v19  ;;  %3499 = vmatmul.mubr.msk.bf16.gmra.mrb[92].mxu1 %vm501_vm1, %v3863_v19  ;;  %v669_v19 = vld [vmem:[#allocation2 + $0x30] sm:$0xff] }
  0xd1   : > { %3528 = vmatprep.mubr.msk.bf16.mxu0 %vm501_vm1, %v3606_v29  ;;  %3502 = vmatprep.mubr.msk.bf16.mxu1 %vm501_vm1, %v3606_v29 }
  0xd8   : > { %3529 = vmatmul.mubr.msk.bf16.gmra.mrb[96].mxu0 %vm501_vm1, %v3607_v30  ;;  %3503 = vmatmul.mubr.msk.bf16.gmra.mrb[96].mxu1 %vm501_vm1, %v3607_v30 }
  0xd9   : > { %3532 = vmatprep.mubr.msk.bf16.mxu0 %vm501_vm1, %v3608_v31  ;;  %3506 = vmatprep.mubr.msk.bf16.mxu1 %vm501_vm1, %v3608_v31 }
  0xe0   : > { %3533 = vmatmul.mubr.msk.bf16.gmra.mrb[100].mxu0 %vm501_vm1, %v3609_v34  ;;  %3507 = vmatmul.mubr.msk.bf16.gmra.mrb[100].mxu1 %vm501_vm1, %v3609_v34 }
  0xe1   : > { %3536 = vmatprep.mubr.msk.bf16.mxu0 %vm501_vm1, %v3610_v35  ;;  %3510 = vmatprep.mubr.msk.bf16.mxu1 %vm501_vm1, %v3610_v35 }
  0xe8   : > { %3537 = vmatmul.mubr.msk.bf16.gmra.mrb[104].mxu0 %vm501_vm1, %v3611_v36  ;;  %3511 = vmatmul.mubr.msk.bf16.gmra.mrb[104].mxu1 %vm501_vm1, %v3611_v36 }
  0xeb   : > { %v3310_v39 = vpop.f32.mrb[0].mxu0  ;;  %v3322_v41 = vpop.f32.mrb[0].mxu1 }
  0xec   : > { %v576_v43 = vpop.f32.mrb[1].mxu0  ;;  %v620_v45 = vpop.f32.mrb[1].mxu1 }
  0xed   : > { %v679_v47 = vadd.f32 %v663_v37, %v576_v43  ;;  %v3311_v48 = vpop.f32.mrb[2].mxu0  ;;  %v687_v49 = vadd.f32 %v671_v38, %v620_v45  ;;  %v3323_v50 = vpop.f32.mrb[2].mxu1 }
  0xee   : > { %v681_v51 = vadd.f32 %v3311_v48, %v665_v40  ;;  %v579_v52 = vpop.f32.mrb[3].mxu0  ;;  %v689_v53 = vadd.f32 %v3323_v50, %v673_v42  ;;  %v623_v54 = vpop.f32.mrb[3].mxu1 }
  0xef   : > { %696 = vst.msk [vmem:[#allocation2] sm:$0xff] %vm387_vm2, %v679_v47  ;;  %v680_v55 = vadd.f32 %v664_v44, %v579_v52  ;;  %704 = vst.msk [vmem:[#allocation2 + $0x40] sm:$0xff] %vm387_vm2, %v687_v49  ;;  %v688_v56 = vadd.f32 %v672_v46, %v623_v54 }
  0xf0   : > { %698 = vst.msk [vmem:[#allocation2 + $0x10] sm:$0xff] %vm387_vm2, %v681_v51  ;;  %706 = vst.msk [vmem:[#allocation2 + $0x50] sm:$0xff] %vm387_vm2, %v689_v53 }
  0xf1   : > { %697 = vst.msk [vmem:[#allocation2 + $0x8] sm:$0xff] %vm387_vm2, %v680_v55  ;;  %705 = vst.msk [vmem:[#allocation2 + $0x48] sm:$0xff] %vm387_vm2, %v688_v56 }
  0xf3   : > { %v3314_v61 = vpop.f32.mrb[4].mxu0  ;;  %v3326_v63 = vpop.f32.mrb[4].mxu1 }
  0xf4   : > { %v683_v1 = vadd.f32 %v3314_v61, %v667_v57  ;;  %v591_v2 = vpop.f32.mrb[5].mxu0  ;;  %v691_v3 = vadd.f32 %v3326_v63, %v675_v58  ;;  %v635_v4 = vpop.f32.mrb[5].mxu1 }
  0xf5   : > { %v682_v5 = vadd.f32 %v666_v59, %v591_v2  ;;  %v3315_v6 = vpop.f32.mrb[6].mxu0  ;;  %v690_v7 = vadd.f32 %v674_v60, %v635_v4  ;;  %v3327_v8 = vpop.f32.mrb[6].mxu1 }
  0xf6   : > { %700 = vst.msk [vmem:[#allocation2 + $0x20] sm:$0xff] %vm387_vm2, %v683_v1  ;;  %v684_v9 = vadd.f32 %v3315_v6, %v668_v62  ;;  %v594_v10 = vpop.f32.mrb[7].mxu0  ;;  %708 = vst.msk [vmem:[#allocation2 + $0x60] sm:$0xff] %vm387_vm2, %v691_v3  ;;  %v692_v11 = vadd.f32 %v3327_v8, %v676_v0  ;;  %v638_v12 = vpop.f32.mrb[7].mxu1  ;;  %v846_v45 = vld [vmem:[#allocation2] sm:$0xff] }
  0xf7   : > { %699 = vst.msk [vmem:[#allocation2 + $0x18] sm:$0xff] %vm387_vm2, %v682_v5  ;;  %707 = vst.msk [vmem:[#allocation2 + $0x58] sm:$0xff] %vm387_vm2, %v690_v7  ;;  %v848_v5 = vld [vmem:[#allocation2 + $0x10] sm:$0xff] }
  0xf8   : > { %701 = vst.msk [vmem:[#allocation2 + $0x28] sm:$0xff] %vm387_vm2, %v684_v9  ;;  %709 = vst.msk [vmem:[#allocation2 + $0x68] sm:$0xff] %vm387_vm2, %v692_v11  ;;  %v847_v46 = vld [vmem:[#allocation2 + $0x8] sm:$0xff] }
  0xfb   : > { %v3318_v15 = vpop.f32.mrb[8].mxu0  ;;  %v3330_v16 = vpop.f32.mrb[8].mxu1 }
  0xfc   : > { %v686_v17 = vadd.f32 %v3318_v15, %v670_v13  ;;  %v606_v18 = vpop.f32.mrb[9].mxu0  ;;  %v694_v20 = vadd.f32 %v3330_v16, %v678_v14  ;;  %v650_v21 = vpop.f32.mrb[9].mxu1 }
  0xfd   : > { %v3319_v23 = vpop.f32.mrb[10].mxu0  ;;  %v3331_v24 = vpop.f32.mrb[10].mxu1  ;;  %v850_v10 = vld [vmem:[#allocation2 + $0x20] sm:$0xff] }
  0xfe   : > { %703 = vst.msk [vmem:[#allocation2 + $0x38] sm:$0xff] %vm387_vm2, %v686_v17  ;;  %v608_v25 = vpop.f32.mrb[11].mxu0  ;;  %711 = vst.msk [vmem:[#allocation2 + $0x78] sm:$0xff] %vm387_vm2, %v694_v20  ;;  %v652_v26 = vpop.f32.mrb[11].mxu1  ;;  %v849_v14 = vld [vmem:[#allocation2 + $0x18] sm:$0xff] }
  0xff   : > { %v685_v27 = vadd.f32 %v669_v19, %v608_v25  ;;  %v693_v28 = vadd.f32 %v677_v22, %v652_v26 }
 0x101   : > { %702 = vst.msk [vmem:[#allocation2 + $0x30] sm:$0xff] %vm387_vm2, %v685_v27  ;;  %710 = vst.msk [vmem:[#allocation2 + $0x70] sm:$0xff] %vm387_vm2, %v693_v28 }
 0x103   : > { %v3362_v29 = vpop.f32.mrb[12].mxu0  ;;  %v3336_v30 = vpop.f32.mrb[12].mxu1 }
 0x104   : > { %v1014_v31 = vpop.f32.mrb[13].mxu0  ;;  %v751_v32 = vpop.f32.mrb[13].mxu1  ;;  %v1153_v33 = vrot.slane %v3362_v29, 4  ;;  %v890_v40 = vrot.slane %v3336_v30, 2 }
 0x105   : > { %v1150_v34 = vrot.slane %v1014_v31, 4  ;;  %v3363_v35 = vpop.f32.mrb[14].mxu0  ;;  %v3337_v36 = vpop.f32.mrb[14].mxu1  ;;  %v887_v41 = vrot.slane %v751_v32, 2 }
 0x106   : > { %v1017_v37 = vpop.f32.mrb[15].mxu0  ;;  %v754_v38 = vpop.f32.mrb[15].mxu1  ;;  %v1155_v51 = vrot.slane %v3363_v35, 4  ;;  %v892_v59 = vrot.slane %v3337_v36, 2 }
 0x107   : > { %v1151_v39 = vrot.slane %v1017_v37, 4  ;;  %v888_v42 = vrot.slane %v754_v38, 2  ;;  %v851_v37 = vld [vmem:[#allocation2 + $0x28] sm:$0xff] }
 0x109   : > { %v1152_v43 = vsel %vm1149_vm3, %v1150_v34, %v1151_v39  ;;  %v1154_v44 = vsel %vm1149_vm3, %v1151_v39, %v1153_v33  ;;  %v889_v47 = vsel %vm886_vm4, %v887_v41, %v888_v42  ;;  %v891_v48 = vsel %vm886_vm4, %v888_v42, %v890_v40  ;;  %v853_v42 = vld [vmem:[#allocation2 + $0x38] sm:$0xff] }
 0x10a   : > { %v943_v49 = vadd.f32 %v889_v47, %v846_v45  ;;  %v944_v50 = vadd.f32 %v891_v48, %v847_v46  ;;  %v852_v47 = vld [vmem:[#allocation2 + $0x30] sm:$0xff] }
 0x10b   : > { %v3366_v52 = vpop.f32.mrb[16].mxu0  ;;  %v3340_v53 = vpop.f32.mrb[16].mxu1 }
 0x10c   : > { %v1160_v54 = vrot.slane %v3366_v52, 4  ;;  %v1030_v55 = vpop.f32.mrb[17].mxu0  ;;  %959 = vst.msk [vmem:[#allocation2] sm:$0xff] %vm387_vm2, %v943_v49  ;;  %960 = vst.msk [vmem:[#allocation2 + $0x8] sm:$0xff] %vm387_vm2, %v944_v50  ;;  %v767_v56 = vpop.f32.mrb[17].mxu1  ;;  %v897_v0 = vrot.slane %v3340_v53, 2 }
 0x10d   : > { %v1156_v57 = vrot.slane %v1030_v55, 4  ;;  %v3367_v58 = vpop.f32.mrb[18].mxu0  ;;  %v893_v60 = vrot.slane %v767_v56, 2  ;;  %v3341_v61 = vpop.f32.mrb[18].mxu1 }
 0x10e   : > { %v1161_v62 = vrot.slane %v3367_v58, 4  ;;  %v1033_v63 = vpop.f32.mrb[19].mxu0  ;;  %v898_v1 = vrot.slane %v3341_v61, 2  ;;  %v770_v3 = vpop.f32.mrb[19].mxu1 }
 0x10f   : > { %v1157_v2 = vsel %vm1149_vm3, %v1155_v51, %v1156_v57  ;;  %v1158_v4 = vrot.slane %v1033_v63, 4  ;;  %v894_v6 = vsel %vm886_vm4, %v892_v59, %v893_v60  ;;  %v895_v7 = vrot.slane %v770_v3, 2 }
 0x110   : > { %v1162_v8 = vsel %vm1149_vm3, %v1160_v54, %v1161_v62  ;;  %v945_v9 = vadd.f32 %v894_v6, %v848_v5  ;;  %v899_v11 = vsel %vm886_vm4, %v897_v0, %v898_v1 }
 0x111   : > { %v1159_v12 = vsel %vm1149_vm3, %v1156_v57, %v1158_v4  ;;  %v947_v13 = vadd.f32 %v899_v11, %v850_v10  ;;  %v896_v15 = vsel %vm886_vm4, %v893_v60, %v895_v7 }
 0x112   : > { %961 = vst.msk [vmem:[#allocation2 + $0x10] sm:$0xff] %vm387_vm2, %v945_v9  ;;  %v946_v16 = vadd.f32 %v896_v15, %v849_v14  ;;  %v855_v9 = vld [vmem:[#allocation2 + $0x48] sm:$0xff] }
 0x113   : > { %v3370_v17 = vpop.f32.mrb[20].mxu0  ;;  %v1109_v18 = vld [vmem:[#allocation2] sm:$0xff]  ;;  %v1110_v19 = vld [vmem:[#allocation2 + $0x8] sm:$0xff]  ;;  %963 = vst.msk [vmem:[#allocation2 + $0x20] sm:$0xff] %vm387_vm2, %v947_v13  ;;  %v3344_v20 = vpop.f32.mrb[20].mxu1 }
 0x114   : > { %v1166_v21 = vrot.slane %v3370_v17, 4  ;;  %v1046_v22 = vpop.f32.mrb[21].mxu0  ;;  %v1206_v23 = vadd.f32 %v1152_v43, %v1109_v18  ;;  %v1207_v24 = vadd.f32 %v1154_v44, %v1110_v19  ;;  %962 = vst.msk [vmem:[#allocation2 + $0x18] sm:$0xff] %vm387_vm2, %v946_v16  ;;  %v783_v25 = vpop.f32.mrb[21].mxu1  ;;  %v903_v32 = vrot.slane %v3344_v20, 2 }
 0x115   : > { %v1163_v26 = vrot.slane %v1046_v22, 4  ;;  %v3371_v27 = vpop.f32.mrb[22].mxu0  ;;  %v900_v28 = vrot.slane %v783_v25, 2  ;;  %v3345_v29 = vpop.f32.mrb[22].mxu1 }
 0x116   : > { %v1168_v30 = vrot.slane %v3371_v27, 4  ;;  %v1049_v31 = vpop.f32.mrb[23].mxu0  ;;  %1222 = vst.msk [vmem:[#allocation2] sm:$0xff] %vm387_vm2, %v1206_v23  ;;  %1223 = vst.msk [vmem:[#allocation2 + $0x8] sm:$0xff] %vm387_vm2, %v1207_v24  ;;  %v905_v33 = vrot.slane %v3345_v29, 2  ;;  %v786_v35 = vpop.f32.mrb[23].mxu1 }
 0x117   : > { %v1164_v34 = vsel %vm1149_vm3, %v1161_v62, %v1163_v26  ;;  %v1165_v36 = vrot.slane %v1049_v31, 4  ;;  %v901_v38 = vsel %vm886_vm4, %v898_v1, %v900_v28  ;;  %v902_v39 = vrot.slane %v786_v35, 2 }
 0x118   : > { %v1169_v40 = vsel %vm1149_vm3, %v1166_v21, %v1168_v30  ;;  %v948_v41 = vadd.f32 %v901_v38, %v851_v37  ;;  %v906_v43 = vsel %vm886_vm4, %v903_v32, %v905_v33  ;;  %v856_v37 = vld [vmem:[#allocation2 + $0x50] sm:$0xff] }
 0x119   : > { %v1167_v44 = vsel %vm1149_vm3, %v1165_v36, %v1166_v21  ;;  %v1111_v45 = vld [vmem:[#allocation2 + $0x10] sm:$0xff]  ;;  %v950_v46 = vadd.f32 %v906_v43, %v853_v42  ;;  %v904_v48 = vsel %vm886_vm4, %v902_v39, %v903_v32  ;;  %v858_v42 = vld [vmem:[#allocation2 + $0x60] sm:$0xff] }
 0x11a   : > { %v1208_v49 = vadd.f32 %v1157_v2, %v1111_v45  ;;  %v1113_v50 = vld [vmem:[#allocation2 + $0x20] sm:$0xff]  ;;  %964 = vst.msk [vmem:[#allocation2 + $0x28] sm:$0xff] %vm387_vm2, %v948_v41  ;;  %v949_v51 = vadd.f32 %v904_v48, %v852_v47 }
 0x11b   : > { %v3374_v52 = vpop.f32.mrb[24].mxu0  ;;  %v1210_v53 = vadd.f32 %v1162_v8, %v1113_v50  ;;  %v1112_v54 = vld [vmem:[#allocation2 + $0x18] sm:$0xff]  ;;  %966 = vst.msk [vmem:[#allocation2 + $0x38] sm:$0xff] %vm387_vm2, %v950_v46  ;;  %v3348_v55 = vpop.f32.mrb[24].mxu1  ;;  %v854_v8 = vld [vmem:[#allocation2 + $0x40] sm:$0xff] }
 0x11c   : > { %v1062_v56 = vpop.f32.mrb[25].mxu0  ;;  %1224 = vst.msk [vmem:[#allocation2 + $0x10] sm:$0xff] %vm387_vm2, %v1208_v49  ;;  %v1209_v57 = vadd.f32 %v1159_v12, %v1112_v54  ;;  %965 = vst.msk [vmem:[#allocation2 + $0x30] sm:$0xff] %vm387_vm2, %v949_v51  ;;  %v799_v58 = vpop.f32.mrb[25].mxu1  ;;  %v1173_v59 = vrot.slane %v3374_v52, 4  ;;  %v910_v2 = vrot.slane %v3348_v55, 2 }
 0x11d   : > { %v1170_v60 = vrot.slane %v1062_v56, 4  ;;  %v3375_v61 = vpop.f32.mrb[26].mxu0  ;;  %1226 = vst.msk [vmem:[#allocation2 + $0x20] sm:$0xff] %vm387_vm2, %v1210_v53  ;;  %v3349_v62 = vpop.f32.mrb[26].mxu1  ;;  %v907_v3 = vrot.slane %v799_v58, 2  ;;  %v857_v46 = vld [vmem:[#allocation2 + $0x58] sm:$0xff] }
 0x11e   : > { %v1065_v63 = vpop.f32.mrb[27].mxu0  ;;  %1225 = vst.msk [vmem:[#allocation2 + $0x18] sm:$0xff] %vm387_vm2, %v1209_v57  ;;  %v802_v0 = vpop.f32.mrb[27].mxu1  ;;  %v1175_v16 = vrot.slane %v3375_v61, 4  ;;  %v912_v27 = vrot.slane %v3349_v62, 2 }
 0x11f   : > { %v1171_v1 = vrot.slane %v1065_v63, 4  ;;  %v908_v4 = vrot.slane %v802_v0, 2 }
 0x121   : > { %v1172_v5 = vsel %vm1149_vm3, %v1170_v60, %v1171_v1  ;;  %v1174_v6 = vsel %vm1149_vm3, %v1171_v1, %v1173_v59  ;;  %v1114_v7 = vld [vmem:[#allocation2 + $0x28] sm:$0xff]  ;;  %v909_v10 = vsel %vm886_vm4, %v907_v3, %v908_v4  ;;  %v911_v11 = vsel %vm886_vm4, %v908_v4, %v910_v2 }
 0x122   : > { %v1211_v12 = vadd.f32 %v1164_v34, %v1114_v7  ;;  %v1116_v13 = vld [vmem:[#allocation2 + $0x38] sm:$0xff]  ;;  %v951_v14 = vadd.f32 %v909_v10, %v854_v8  ;;  %v952_v15 = vadd.f32 %v911_v11, %v855_v9 }
 0x123   : > { %v3378_v17 = vpop.f32.mrb[28].mxu0  ;;  %v1213_v18 = vadd.f32 %v1169_v40, %v1116_v13  ;;  %v1115_v19 = vld [vmem:[#allocation2 + $0x30] sm:$0xff]  ;;  %v3352_v20 = vpop.f32.mrb[28].mxu1  ;;  %v861_v10 = vld [vmem:[#allocation2 + $0x78] sm:$0xff] }
 0x124   : > { %v1180_v21 = vrot.slane %v3378_v17, 4  ;;  %v1078_v22 = vpop.f32.mrb[29].mxu0  ;;  %1227 = vst.msk [vmem:[#allocation2 + $0x28] sm:$0xff] %vm387_vm2, %v1211_v12  ;;  %v1212_v23 = vadd.f32 %v1167_v44, %v1115_v19  ;;  %967 = vst.msk [vmem:[#allocation2 + $0x40] sm:$0xff] %vm387_vm2, %v951_v14  ;;  %v815_v24 = vpop.f32.mrb[29].mxu1  ;;  %v917_v32 = vrot.slane %v3352_v20, 2 }
 0x125   : > { %968 = vst.msk [vmem:[#allocation2 + $0x48] sm:$0xff] %vm387_vm2, %v952_v15  ;;  %v1176_v25 = vrot.slane %v1078_v22, 4  ;;  %v3379_v26 = vpop.f32.mrb[30].mxu0  ;;  %1229 = vst.msk [vmem:[#allocation2 + $0x38] sm:$0xff] %vm387_vm2, %v1213_v18  ;;  %v913_v28 = vrot.slane %v815_v24, 2  ;;  %v3353_v29 = vpop.f32.mrb[30].mxu1 }
 0x126   : > { %v1181_v30 = vrot.slane %v3379_v26, 4  ;;  %v1081_v31 = vpop.f32.mrb[31].mxu0  ;;  %1228 = vst.msk [vmem:[#allocation2 + $0x30] sm:$0xff] %vm387_vm2, %v1212_v23  ;;  %v918_v33 = vrot.slane %v3353_v29, 2  ;;  %v818_v35 = vpop.f32.mrb[31].mxu1  ;;  %v860_v15 = vld [vmem:[#allocation2 + $0x70] sm:$0xff] }
 0x127   : > { %v1177_v34 = vsel %vm1149_vm3, %v1175_v16, %v1176_v25  ;;  %v1178_v36 = vrot.slane %v1081_v31, 4  ;;  %v914_v38 = vsel %vm886_vm4, %v912_v27, %v913_v28  ;;  %v915_v39 = vrot.slane %v818_v35, 2  ;;  %v1388_v27 = vld [vmem:[#allocation2] sm:$0xff] }
 0x128   : > { %v1182_v40 = vsel %vm1149_vm3, %v1180_v21, %v1181_v30  ;;  %v953_v41 = vadd.f32 %v914_v38, %v856_v37  ;;  %v919_v43 = vsel %vm886_vm4, %v917_v32, %v918_v33  ;;  %v1389_v37 = vld [vmem:[#allocation2 + $0x8] sm:$0xff] }
 0x129   : > { %v1179_v44 = vsel %vm1149_vm3, %v1176_v25, %v1178_v36  ;;  %v955_v45 = vadd.f32 %v919_v43, %v858_v42  ;;  %v916_v47 = vsel %vm886_vm4, %v913_v28, %v915_v39 }
 0x12a   : > { %969 = vst.msk [vmem:[#allocation2 + $0x50] sm:$0xff] %vm387_vm2, %v953_v41  ;;  %v954_v48 = vadd.f32 %v916_v47, %v857_v46 }
 0x12b   : > { %v3382_v49 = vpop.f32.mrb[32].mxu0  ;;  %v1117_v50 = vld [vmem:[#allocation2 + $0x40] sm:$0xff]  ;;  %971 = vst.msk [vmem:[#allocation2 + $0x60] sm:$0xff] %vm387_vm2, %v955_v45  ;;  %v3356_v52 = vpop.f32.mrb[32].mxu1 }
 0x12c   : > { %v1118_v51 = vld [vmem:[#allocation2 + $0x48] sm:$0xff]  ;;  %v1186_v53 = vrot.slane %v3382_v49, 4  ;;  %v1094_v54 = vpop.f32.mrb[33].mxu0  ;;  %v1214_v55 = vadd.f32 %v1172_v5, %v1117_v50  ;;  %970 = vst.msk [vmem:[#allocation2 + $0x58] sm:$0xff] %vm387_vm2, %v954_v48  ;;  %v831_v57 = vpop.f32.mrb[33].mxu1  ;;  %v923_v0 = vrot.slane %v3356_v52, 2 }
 0x12d   : > { %v1215_v56 = vadd.f32 %v1174_v6, %v1118_v51  ;;  %v1183_v58 = vrot.slane %v1094_v54, 4  ;;  %v3383_v59 = vpop.f32.mrb[34].mxu0  ;;  %v920_v60 = vrot.slane %v831_v57, 2  ;;  %v3357_v61 = vpop.f32.mrb[34].mxu1  ;;  %v859_v5 = vld [vmem:[#allocation2 + $0x68] sm:$0xff]  ;;  %v1392_v50 = vld [vmem:[#allocation2 + $0x20] sm:$0xff] }
 0x12e   : > { %v1188_v62 = vrot.slane %v3383_v59, 4  ;;  %v1097_v63 = vpop.f32.mrb[35].mxu0  ;;  %1230 = vst.msk [vmem:[#allocation2 + $0x40] sm:$0xff] %vm387_vm2, %v1214_v55  ;;  %v925_v1 = vrot.slane %v3357_v61, 2  ;;  %v834_v3 = vpop.f32.mrb[35].mxu1  ;;  %v1393_v61 = vld [vmem:[#allocation2 + $0x28] sm:$0xff] }
 0x12f   : > { %1231 = vst.msk [vmem:[#allocation2 + $0x48] sm:$0xff] %vm387_vm2, %v1215_v56  ;;  %v1184_v2 = vsel %vm1149_vm3, %v1181_v30, %v1183_v58  ;;  %v1185_v4 = vrot.slane %v1097_v63, 4  ;;  %v921_v6 = vsel %vm886_vm4, %v918_v33, %v920_v60  ;;  %v922_v7 = vrot.slane %v834_v3, 2  ;;  %v1390_v33 = vld [vmem:[#allocation2 + $0x10] sm:$0xff]  ;;  %v1391_v56 = vld [vmem:[#allocation2 + $0x18] sm:$0xff] }
 0x130   : > { %v1189_v8 = vsel %vm1149_vm3, %v1186_v53, %v1188_v62  ;;  %v956_v9 = vadd.f32 %v921_v6, %v859_v5  ;;  %v926_v11 = vsel %vm886_vm4, %v923_v0, %v925_v1 }
 0x131   : > { %v1187_v12 = vsel %vm1149_vm3, %v1185_v4, %v1186_v53  ;;  %v1119_v13 = vld [vmem:[#allocation2 + $0x50] sm:$0xff]  ;;  %v958_v14 = vadd.f32 %v926_v11, %v861_v10  ;;  %v924_v16 = vsel %vm886_vm4, %v922_v7, %v923_v0 }
 0x132   : > { %v1216_v17 = vadd.f32 %v1177_v34, %v1119_v13  ;;  %v1121_v18 = vld [vmem:[#allocation2 + $0x60] sm:$0xff]  ;;  %972 = vst.msk [vmem:[#allocation2 + $0x68] sm:$0xff] %vm387_vm2, %v956_v9  ;;  %v957_v19 = vadd.f32 %v924_v16, %v860_v15 }
 0x133   : > { %v3414_v20 = vpop.f32.mrb[36].mxu0  ;;  %v1218_v21 = vadd.f32 %v1182_v40, %v1121_v18  ;;  %v1120_v22 = vld [vmem:[#allocation2 + $0x58] sm:$0xff]  ;;  %974 = vst.msk [vmem:[#allocation2 + $0x78] sm:$0xff] %vm387_vm2, %v958_v14  ;;  %v3388_v23 = vpop.f32.mrb[36].mxu1 }
 0x134   : > { %v1475_v24 = vpop.f32.mrb[37].mxu0  ;;  %1232 = vst.msk [vmem:[#allocation2 + $0x50] sm:$0xff] %vm387_vm2, %v1216_v17  ;;  %v1217_v25 = vadd.f32 %v1179_v44, %v1120_v22  ;;  %973 = vst.msk [vmem:[#allocation2 + $0x70] sm:$0xff] %vm387_vm2, %v957_v19  ;;  %v1301_v26 = vpop.f32.mrb[37].mxu1  ;;  %v1613_v28 = vrot.slane %v3414_v20, 2  ;;  %v1395_v14 = vld [vmem:[#allocation2 + $0x38] sm:$0xff] }
 0x135   : > { %v1610_v29 = vrot.slane %v1475_v24, 2  ;;  %v3415_v30 = vpop.f32.mrb[38].mxu0  ;;  %1234 = vst.msk [vmem:[#allocation2 + $0x60] sm:$0xff] %vm387_vm2, %v1218_v21  ;;  %v1404_v31 = vadd.f32 %v1388_v27, %v1301_v26  ;;  %v3389_v32 = vpop.f32.mrb[38].mxu1 }
 0x136   : > { %v1478_v34 = vpop.f32.mrb[39].mxu0  ;;  %1233 = vst.msk [vmem:[#allocation2 + $0x58] sm:$0xff] %vm387_vm2, %v1217_v25  ;;  %v1406_v35 = vadd.f32 %v3389_v32, %v1390_v33  ;;  %v1304_v36 = vpop.f32.mrb[39].mxu1  ;;  %v1615_v45 = vrot.slane %v3415_v30, 2 }
 0x137   : > { %v1611_v38 = vrot.slane %v1478_v34, 2  ;;  %1420 = vst.msk [vmem:[#allocation2] sm:$0xff] %vm387_vm2, %v1404_v31  ;;  %v1405_v39 = vadd.f32 %v1389_v37, %v1304_v36 }
 0x138   : > { %1422 = vst.msk [vmem:[#allocation2 + $0x10] sm:$0xff] %vm387_vm2, %v1406_v35 }
 0x139   : > { %v1612_v40 = vsel %vm886_vm4, %v1610_v29, %v1611_v38  ;;  %v1614_v41 = vsel %vm886_vm4, %v1611_v38, %v1613_v28  ;;  %v1122_v42 = vld [vmem:[#allocation2 + $0x68] sm:$0xff]  ;;  %1421 = vst.msk [vmem:[#allocation2 + $0x8] sm:$0xff] %vm387_vm2, %v1405_v39  ;;  %v1394_v29 = vld [vmem:[#allocation2 + $0x30] sm:$0xff] }
 0x13a   : > { %v1219_v43 = vadd.f32 %v1184_v2, %v1122_v42  ;;  %v1124_v44 = vld [vmem:[#allocation2 + $0x78] sm:$0xff] }
 0x13b   : > { %v3418_v46 = vpop.f32.mrb[40].mxu0  ;;  %v1221_v47 = vadd.f32 %v1189_v8, %v1124_v44  ;;  %v1123_v48 = vld [vmem:[#allocation2 + $0x70] sm:$0xff]  ;;  %v3392_v49 = vpop.f32.mrb[40].mxu1 }
 0x13c   : > { %v1620_v51 = vrot.slane %v3418_v46, 2  ;;  %v1491_v52 = vpop.f32.mrb[41].mxu0  ;;  %1235 = vst.msk [vmem:[#allocation2 + $0x68] sm:$0xff] %vm387_vm2, %v1219_v43  ;;  %v1220_v53 = vadd.f32 %v1187_v12, %v1123_v48  ;;  %v1408_v54 = vadd.f32 %v3392_v49, %v1392_v50  ;;  %v1316_v55 = vpop.f32.mrb[41].mxu1  ;;  %v1398_v48 = vld [vmem:[#allocation2 + $0x50] sm:$0xff] }
 0x13d   : > { %v1616_v57 = vrot.slane %v1491_v52, 2  ;;  %v3419_v58 = vpop.f32.mrb[42].mxu0  ;;  %1237 = vst.msk [vmem:[#allocation2 + $0x78] sm:$0xff] %vm387_vm2, %v1221_v47  ;;  %v1407_v59 = vadd.f32 %v1391_v56, %v1316_v55  ;;  %v3393_v60 = vpop.f32.mrb[42].mxu1 }
 0x13e   : > { %v1621_v62 = vrot.slane %v3419_v58, 2  ;;  %v1494_v63 = vpop.f32.mrb[43].mxu0  ;;  %1236 = vst.msk [vmem:[#allocation2 + $0x70] sm:$0xff] %vm387_vm2, %v1220_v53  ;;  %v1570_v0 = vld [vmem:[#allocation2] sm:$0xff]  ;;  %1424 = vst.msk [vmem:[#allocation2 + $0x20] sm:$0xff] %vm387_vm2, %v1408_v54  ;;  %v1409_v2 = vadd.f32 %v3393_v60, %v1393_v61  ;;  %v1319_v3 = vpop.f32.mrb[43].mxu1 }
 0x13f   : > { %v1617_v1 = vsel %vm886_vm4, %v1615_v45, %v1616_v57  ;;  %v1618_v4 = vrot.slane %v1494_v63, 2  ;;  %v1666_v5 = vadd.f32 %v1612_v40, %v1570_v0  ;;  %1423 = vst.msk [vmem:[#allocation2 + $0x18] sm:$0xff] %vm387_vm2, %v1407_v59  ;;  %v1572_v6 = vld [vmem:[#allocation2 + $0x10] sm:$0xff]  ;;  %v1397_v53 = vld [vmem:[#allocation2 + $0x48] sm:$0xff]  ;;  %v1400_v63 = vld [vmem:[#allocation2 + $0x60] sm:$0xff] }
 0x140   : > { %v1622_v7 = vsel %vm886_vm4, %v1620_v51, %v1621_v62  ;;  %v1571_v8 = vld [vmem:[#allocation2 + $0x8] sm:$0xff]  ;;  %v1668_v9 = vadd.f32 %v1617_v1, %v1572_v6  ;;  %1425 = vst.msk [vmem:[#allocation2 + $0x28] sm:$0xff] %vm387_vm2, %v1409_v2 }
 0x141   : > { %v1619_v10 = vsel %vm886_vm4, %v1616_v57, %v1618_v4  ;;  %v1667_v11 = vadd.f32 %v1614_v41, %v1571_v8  ;;  %1682 = vst.msk [vmem:[#allocation2] sm:$0xff] %vm387_vm2, %v1666_v5  ;;  %v1396_v41 = vld [vmem:[#allocation2 + $0x40] sm:$0xff]  ;;  %v1399_v4 = vld [vmem:[#allocation2 + $0x58] sm:$0xff] }
 0x142   : > { %1684 = vst.msk [vmem:[#allocation2 + $0x10] sm:$0xff] %vm387_vm2, %v1668_v9 }
 0x143   : > { %v3422_v12 = vpop.f32.mrb[44].mxu0  ;;  %1683 = vst.msk [vmem:[#allocation2 + $0x8] sm:$0xff] %vm387_vm2, %v1667_v11  ;;  %v3396_v13 = vpop.f32.mrb[44].mxu1  ;;  %v1401_v9 = vld [vmem:[#allocation2 + $0x68] sm:$0xff] }
 0x144   : > { %v1626_v15 = vrot.slane %v3422_v12, 2  ;;  %v1507_v16 = vpop.f32.mrb[45].mxu0  ;;  %v1411_v17 = vadd.f32 %v3396_v13, %v1395_v14  ;;  %v1331_v18 = vpop.f32.mrb[45].mxu1 }
 0x145   : > { %v1623_v19 = vrot.slane %v1507_v16, 2  ;;  %v3423_v20 = vpop.f32.mrb[46].mxu0  ;;  %v1574_v21 = vld [vmem:[#allocation2 + $0x20] sm:$0xff]  ;;  %v3397_v22 = vpop.f32.mrb[46].mxu1 }
 0x146   : > { %v1628_v23 = vrot.slane %v3423_v20, 2  ;;  %v1510_v24 = vpop.f32.mrb[47].mxu0  ;;  %v1670_v25 = vadd.f32 %v1622_v7, %v1574_v21  ;;  %v1573_v26 = vld [vmem:[#allocation2 + $0x18] sm:$0xff]  ;;  %1427 = vst.msk [vmem:[#allocation2 + $0x38] sm:$0xff] %vm387_vm2, %v1411_v17  ;;  %v1333_v28 = vpop.f32.mrb[47].mxu1 }
 0x147   : > { %v1624_v27 = vsel %vm886_vm4, %v1621_v62, %v1623_v19  ;;  %v1625_v30 = vrot.slane %v1510_v24, 2  ;;  %v1669_v31 = vadd.f32 %v1619_v10, %v1573_v26  ;;  %v1575_v32 = vld [vmem:[#allocation2 + $0x28] sm:$0xff]  ;;  %v1410_v33 = vadd.f32 %v1394_v29, %v1333_v28  ;;  %v1403_v26 = vld [vmem:[#allocation2 + $0x78] sm:$0xff] }
 0x148   : > { %v1629_v34 = vsel %vm886_vm4, %v1626_v15, %v1628_v23  ;;  %1686 = vst.msk [vmem:[#allocation2 + $0x20] sm:$0xff] %vm387_vm2, %v1670_v25  ;;  %v1671_v35 = vadd.f32 %v1624_v27, %v1575_v32 }
 0x149   : > { %v1627_v36 = vsel %vm886_vm4, %v1625_v30, %v1626_v15  ;;  %1685 = vst.msk [vmem:[#allocation2 + $0x18] sm:$0xff] %vm387_vm2, %v1669_v31  ;;  %1426 = vst.msk [vmem:[#allocation2 + $0x30] sm:$0xff] %vm387_vm2, %v1410_v33 }
 0x14a   : > { %1687 = vst.msk [vmem:[#allocation2 + $0x28] sm:$0xff] %vm387_vm2, %v1671_v35 }
 0x14b   : > { %v3426_v37 = vpop.f32.mrb[48].mxu0  ;;  %v3400_v38 = vpop.f32.mrb[48].mxu1 }
 0x14c   : > { %v1523_v39 = vpop.f32.mrb[49].mxu0  ;;  %v1345_v40 = vpop.f32.mrb[49].mxu1  ;;  %v1633_v42 = vrot.slane %v3426_v37, 2 }
 0x14d   : > { %v1630_v43 = vrot.slane %v1523_v39, 2  ;;  %v3427_v44 = vpop.f32.mrb[50].mxu0  ;;  %v1577_v45 = vld [vmem:[#allocation2 + $0x38] sm:$0xff]  ;;  %v1412_v46 = vadd.f32 %v1396_v41, %v1345_v40  ;;  %v3401_v47 = vpop.f32.mrb[50].mxu1  ;;  %v1402_v41 = vld [vmem:[#allocation2 + $0x70] sm:$0xff] }
 0x14e   : > { %v1526_v49 = vpop.f32.mrb[51].mxu0  ;;  %v1673_v50 = vadd.f32 %v1629_v34, %v1577_v45  ;;  %v1414_v51 = vadd.f32 %v3401_v47, %v1398_v48  ;;  %v1348_v52 = vpop.f32.mrb[51].mxu1  ;;  %v1635_v60 = vrot.slane %v3427_v44, 2 }
 0x14f   : > { %v1631_v54 = vrot.slane %v1526_v49, 2  ;;  %1428 = vst.msk [vmem:[#allocation2 + $0x40] sm:$0xff] %vm387_vm2, %v1412_v46  ;;  %v1413_v55 = vadd.f32 %v1397_v53, %v1348_v52 }
 0x150   : > { %1689 = vst.msk [vmem:[#allocation2 + $0x38] sm:$0xff] %vm387_vm2, %v1673_v50  ;;  %1430 = vst.msk [vmem:[#allocation2 + $0x50] sm:$0xff] %vm387_vm2, %v1414_v51  ;;  %v1576_v56 = vld [vmem:[#allocation2 + $0x30] sm:$0xff] }
 0x151   : > { %v1632_v57 = vsel %vm886_vm4, %v1630_v43, %v1631_v54  ;;  %v1634_v58 = vsel %vm886_vm4, %v1631_v54, %v1633_v42  ;;  %v1672_v59 = vadd.f32 %v1627_v36, %v1576_v56  ;;  %1429 = vst.msk [vmem:[#allocation2 + $0x48] sm:$0xff] %vm387_vm2, %v1413_v55 }
 0x153   : > { %v3430_v61 = vpop.f32.mrb[52].mxu0  ;;  %1688 = vst.msk [vmem:[#allocation2 + $0x30] sm:$0xff] %vm387_vm2, %v1672_v59  ;;  %v3404_v62 = vpop.f32.mrb[52].mxu1 }
 0x154   : > { %v1640_v0 = vrot.slane %v3430_v61, 2  ;;  %v1539_v1 = vpop.f32.mrb[53].mxu0  ;;  %v1416_v2 = vadd.f32 %v3404_v62, %v1400_v63  ;;  %v1360_v3 = vpop.f32.mrb[53].mxu1 }
 0x155   : > { %v1636_v5 = vrot.slane %v1539_v1, 2  ;;  %v3431_v6 = vpop.f32.mrb[54].mxu0  ;;  %v1415_v7 = vadd.f32 %v1399_v4, %v1360_v3  ;;  %v3405_v8 = vpop.f32.mrb[54].mxu1  ;;  %v1833_v1 = vld [vmem:[#allocation2 + $0x8] sm:$0xff] }
 0x156   : > { %v1641_v10 = vrot.slane %v3431_v6, 2  ;;  %v1542_v11 = vpop.f32.mrb[55].mxu0  ;;  %v1578_v12 = vld [vmem:[#allocation2 + $0x40] sm:$0xff]  ;;  %1432 = vst.msk [vmem:[#allocation2 + $0x60] sm:$0xff] %vm387_vm2, %v1416_v2  ;;  %v1417_v14 = vadd.f32 %v3405_v8, %v1401_v9  ;;  %v1363_v15 = vpop.f32.mrb[55].mxu1 }
 0x157   : > { %v1637_v13 = vsel %vm886_vm4, %v1635_v60, %v1636_v5  ;;  %v1638_v16 = vrot.slane %v1542_v11, 2  ;;  %v1674_v17 = vadd.f32 %v1632_v57, %v1578_v12  ;;  %1431 = vst.msk [vmem:[#allocation2 + $0x58] sm:$0xff] %vm387_vm2, %v1415_v7  ;;  %v1580_v18 = vld [vmem:[#allocation2 + $0x50] sm:$0xff] }
 0x158   : > { %v1642_v19 = vsel %vm886_vm4, %v1640_v0, %v1641_v10  ;;  %v1579_v20 = vld [vmem:[#allocation2 + $0x48] sm:$0xff]  ;;  %v1676_v21 = vadd.f32 %v1637_v13, %v1580_v18  ;;  %1433 = vst.msk [vmem:[#allocation2 + $0x68] sm:$0xff] %vm387_vm2, %v1417_v14  ;;  %v1832_v0 = vld [vmem:[#allocation2] sm:$0xff]  ;;  %v1834_v18 = vld [vmem:[#allocation2 + $0x10] sm:$0xff] }
 0x159   : > { %v1639_v22 = vsel %vm886_vm4, %v1636_v5, %v1638_v16  ;;  %v1675_v23 = vadd.f32 %v1634_v58, %v1579_v20  ;;  %1690 = vst.msk [vmem:[#allocation2 + $0x40] sm:$0xff] %vm387_vm2, %v1674_v17 }
 0x15a   : > { %1692 = vst.msk [vmem:[#allocation2 + $0x50] sm:$0xff] %vm387_vm2, %v1676_v21 }
 0x15b   : > { %v3434_v24 = vpop.f32.mrb[56].mxu0  ;;  %1691 = vst.msk [vmem:[#allocation2 + $0x48] sm:$0xff] %vm387_vm2, %v1675_v23  ;;  %v3408_v25 = vpop.f32.mrb[56].mxu1 }
 0x15c   : > { %v1646_v27 = vrot.slane %v3434_v24, 2  ;;  %v1555_v28 = vpop.f32.mrb[57].mxu0  ;;  %v1419_v29 = vadd.f32 %v3408_v25, %v1403_v26  ;;  %v1375_v30 = vpop.f32.mrb[57].mxu1  ;;  %v1835_v25 = vld [vmem:[#allocation2 + $0x18] sm:$0xff] }
 0x15d   : > { %v1643_v31 = vrot.slane %v1555_v28, 2  ;;  %v3435_v32 = vpop.f32.mrb[58].mxu0  ;;  %v1582_v33 = vld [vmem:[#allocation2 + $0x60] sm:$0xff]  ;;  %v3409_v34 = vpop.f32.mrb[58].mxu1 }
 0x15e   : > { %v1648_v35 = vrot.slane %v3435_v32, 2  ;;  %v1558_v36 = vpop.f32.mrb[59].mxu0  ;;  %v1678_v37 = vadd.f32 %v1642_v19, %v1582_v33  ;;  %v1581_v38 = vld [vmem:[#allocation2 + $0x58] sm:$0xff]  ;;  %1435 = vst.msk [vmem:[#allocation2 + $0x78] sm:$0xff] %vm387_vm2, %v1419_v29  ;;  %v1377_v40 = vpop.f32.mrb[59].mxu1 }
 0x15f   : > { %v1644_v39 = vsel %vm886_vm4, %v1641_v10, %v1643_v31  ;;  %v1645_v42 = vrot.slane %v1558_v36, 2  ;;  %v1677_v43 = vadd.f32 %v1639_v22, %v1581_v38  ;;  %v1583_v44 = vld [vmem:[#allocation2 + $0x68] sm:$0xff]  ;;  %v1418_v45 = vadd.f32 %v1402_v41, %v1377_v40  ;;  %v1836_v22 = vld [vmem:[#allocation2 + $0x20] sm:$0xff] }
 0x160   : > { %v1649_v46 = vsel %vm886_vm4, %v1646_v27, %v1648_v35  ;;  %1694 = vst.msk [vmem:[#allocation2 + $0x60] sm:$0xff] %vm387_vm2, %v1678_v37  ;;  %v1679_v47 = vadd.f32 %v1644_v39, %v1583_v44 }
 0x161   : > { %v1647_v48 = vsel %vm886_vm4, %v1645_v42, %v1646_v27  ;;  %1693 = vst.msk [vmem:[#allocation2 + $0x58] sm:$0xff] %vm387_vm2, %v1677_v43  ;;  %1434 = vst.msk [vmem:[#allocation2 + $0x70] sm:$0xff] %vm387_vm2, %v1418_v45  ;;  %v1837_v43 = vld [vmem:[#allocation2 + $0x28] sm:$0xff] }
 0x162   : > { %1695 = vst.msk [vmem:[#allocation2 + $0x68] sm:$0xff] %vm387_vm2, %v1679_v47  ;;  %v1839_v47 = vld [vmem:[#allocation2 + $0x38] sm:$0xff] }
 0x163   : > { %v3466_v49 = vpop.f32.mrb[60].mxu0  ;;  %v3440_v50 = vpop.f32.mrb[60].mxu1 }
 0x164   : > { %v2023_v51 = vpop.f32.mrb[61].mxu0  ;;  %v1737_v52 = vpop.f32.mrb[61].mxu1  ;;  %v1875_v59 = vrot.slane %v3440_v50, 4 }
 0x165   : > { %v4198_v53 = vpop.f32.mrb[62].mxu0  ;;  %v1585_v54 = vld [vmem:[#allocation2 + $0x78] sm:$0xff]  ;;  %v3441_v55 = vpop.f32.mrb[62].mxu1  ;;  %v1872_v60 = vrot.slane %v1737_v52, 4 }
 0x166   : > { %v2026_v56 = vpop.f32.mrb[63].mxu0  ;;  %v1681_v57 = vadd.f32 %v1649_v46, %v1585_v54  ;;  %v1740_v58 = vpop.f32.mrb[63].mxu1  ;;  %v1877_v11 = vrot.slane %v3441_v55, 4 }
 0x167   : > { %v1873_v61 = vrot.slane %v1740_v58, 4 }
 0x168   : > { %1697 = vst.msk [vmem:[#allocation2 + $0x78] sm:$0xff] %vm387_vm2, %v1681_v57  ;;  %v1584_v62 = vld [vmem:[#allocation2 + $0x70] sm:$0xff] }
 0x169   : > { %v1680_v63 = vadd.f32 %v1647_v48, %v1584_v62  ;;  %v1874_v2 = vsel %vm1149_vm3, %v1872_v60, %v1873_v61  ;;  %v1876_v3 = vsel %vm1149_vm3, %v1873_v61, %v1875_v59 }
 0x16a   : > { %v1928_v4 = vadd.f32 %v1874_v2, %v1832_v0  ;;  %v1929_v5 = vadd.f32 %v1876_v3, %v1833_v1 }
 0x16b   : > { %v3470_v6 = vpop.f32.mrb[64].mxu0  ;;  %1696 = vst.msk [vmem:[#allocation2 + $0x70] sm:$0xff] %vm387_vm2, %v1680_v63  ;;  %v3444_v7 = vpop.f32.mrb[64].mxu1 }
 0x16c   : > { %v4204_v8 = vpop.f32.mrb[65].mxu0  ;;  %1944 = vst.msk [vmem:[#allocation2] sm:$0xff] %vm387_vm2, %v1928_v4  ;;  %1945 = vst.msk [vmem:[#allocation2 + $0x8] sm:$0xff] %vm387_vm2, %v1929_v5  ;;  %v1753_v9 = vpop.f32.mrb[65].mxu1  ;;  %v1882_v15 = vrot.slane %v3444_v7, 4  ;;  %v1840_v7 = vld [vmem:[#allocation2 + $0x40] sm:$0xff] }
 0x16d   : > { %v4208_v10 = vpop.f32.mrb[66].mxu0  ;;  %v1878_v12 = vrot.slane %v1753_v9, 4  ;;  %v3445_v13 = vpop.f32.mrb[66].mxu1  ;;  %v1841_v9 = vld [vmem:[#allocation2 + $0x48] sm:$0xff] }
 0x16e   : > { %v2041_v14 = vpop.f32.mrb[67].mxu0  ;;  %v1883_v16 = vrot.slane %v3445_v13, 4  ;;  %v1756_v17 = vpop.f32.mrb[67].mxu1 }
 0x16f   : > { %v1879_v19 = vsel %vm1149_vm3, %v1877_v11, %v1878_v12  ;;  %v1880_v20 = vrot.slane %v1756_v17, 4 }
 0x170   : > { %v1930_v21 = vadd.f32 %v1879_v19, %v1834_v18  ;;  %v1884_v23 = vsel %vm1149_vm3, %v1882_v15, %v1883_v16 }
 0x171   : > { %v1932_v24 = vadd.f32 %v1884_v23, %v1836_v22  ;;  %v1881_v26 = vsel %vm1149_vm3, %v1878_v12, %v1880_v20 }
 0x172   : > { %1946 = vst.msk [vmem:[#allocation2 + $0x10] sm:$0xff] %vm387_vm2, %v1930_v21  ;;  %v1931_v27 = vadd.f32 %v1881_v26, %v1835_v25 }
 0x173   : > { %v3474_v28 = vpop.f32.mrb[68].mxu0  ;;  %v2110_v29 = vld [vmem:[#allocation2] sm:$0xff]  ;;  %1948 = vst.msk [vmem:[#allocation2 + $0x20] sm:$0xff] %vm387_vm2, %v1932_v24  ;;  %v2111_v30 = vld [vmem:[#allocation2 + $0x8] sm:$0xff]  ;;  %v3448_v31 = vpop.f32.mrb[68].mxu1 }
 0x174   : > { %v2053_v32 = vpop.f32.mrb[69].mxu0  ;;  %v2126_v33 = vadd.f32 %v2110_v29, %v2023_v51  ;;  %v2127_v34 = vadd.f32 %v2111_v30, %v2026_v56  ;;  %1947 = vst.msk [vmem:[#allocation2 + $0x18] sm:$0xff] %vm387_vm2, %v1931_v27  ;;  %v1769_v35 = vpop.f32.mrb[69].mxu1  ;;  %v1888_v40 = vrot.slane %v3448_v31, 4  ;;  %v1838_v51 = vld [vmem:[#allocation2 + $0x30] sm:$0xff] }
 0x175   : > { %v3475_v36 = vpop.f32.mrb[70].mxu0  ;;  %v1885_v37 = vrot.slane %v1769_v35, 4  ;;  %v3449_v38 = vpop.f32.mrb[70].mxu1  ;;  %v1842_v30 = vld [vmem:[#allocation2 + $0x50] sm:$0xff] }
 0x176   : > { %v2055_v39 = vpop.f32.mrb[71].mxu0  ;;  %2142 = vst.msk [vmem:[#allocation2] sm:$0xff] %vm387_vm2, %v2126_v33  ;;  %2143 = vst.msk [vmem:[#allocation2 + $0x8] sm:$0xff] %vm387_vm2, %v2127_v34  ;;  %v1890_v41 = vrot.slane %v3449_v38, 4  ;;  %v1772_v42 = vpop.f32.mrb[71].mxu1  ;;  %v1844_v34 = vld [vmem:[#allocation2 + $0x60] sm:$0xff] }
 0x177   : > { %v1886_v44 = vsel %vm1149_vm3, %v1883_v16, %v1885_v37  ;;  %v1887_v45 = vrot.slane %v1772_v42, 4  ;;  %v1843_v37 = vld [vmem:[#allocation2 + $0x58] sm:$0xff] }
 0x178   : > { %v1933_v46 = vadd.f32 %v1886_v44, %v1837_v43  ;;  %v1891_v48 = vsel %vm1149_vm3, %v1888_v40, %v1890_v41 }
 0x179   : > { %v2112_v49 = vld [vmem:[#allocation2 + $0x10] sm:$0xff]  ;;  %v1935_v50 = vadd.f32 %v1891_v48, %v1839_v47  ;;  %v1889_v52 = vsel %vm1149_vm3, %v1887_v45, %v1888_v40 }
 0x17a   : > { %v2128_v54 = vadd.f32 %v4198_v53, %v2112_v49  ;;  %v2114_v55 = vld [vmem:[#allocation2 + $0x20] sm:$0xff]  ;;  %1949 = vst.msk [vmem:[#allocation2 + $0x28] sm:$0xff] %vm387_vm2, %v1933_v46  ;;  %v1934_v56 = vadd.f32 %v1889_v52, %v1838_v51 }
 0x17b   : > { %v3478_v57 = vpop.f32.mrb[72].mxu0  ;;  %v2130_v58 = vadd.f32 %v3470_v6, %v2114_v55  ;;  %v2113_v59 = vld [vmem:[#allocation2 + $0x18] sm:$0xff]  ;;  %1951 = vst.msk [vmem:[#allocation2 + $0x38] sm:$0xff] %vm387_vm2, %v1935_v50  ;;  %v3452_v60 = vpop.f32.mrb[72].mxu1 }
 0x17c   : > { %v2067_v61 = vpop.f32.mrb[73].mxu0  ;;  %2144 = vst.msk [vmem:[#allocation2 + $0x10] sm:$0xff] %vm387_vm2, %v2128_v54  ;;  %v2129_v62 = vadd.f32 %v2113_v59, %v4204_v8  ;;  %1950 = vst.msk [vmem:[#allocation2 + $0x30] sm:$0xff] %vm387_vm2, %v1934_v56  ;;  %v1785_v63 = vpop.f32.mrb[73].mxu1  ;;  %v1895_v3 = vrot.slane %v3452_v60, 4  ;;  %v1845_v56 = vld [vmem:[#allocation2 + $0x68] sm:$0xff] }
 0x17d   : > { %v4227_v0 = vpop.f32.mrb[74].mxu0  ;;  %2146 = vst.msk [vmem:[#allocation2 + $0x20] sm:$0xff] %vm387_vm2, %v2130_v58  ;;  %v3453_v53 = vpop.f32.mrb[74].mxu1  ;;  %v1892_v4 = vrot.slane %v1785_v63, 4  ;;  %v1847_v60 = vld [vmem:[#allocation2 + $0x78] sm:$0xff] }
 0x17e   : > { %v2070_v1 = vpop.f32.mrb[75].mxu0  ;;  %2145 = vst.msk [vmem:[#allocation2 + $0x18] sm:$0xff] %vm387_vm2, %v2129_v62  ;;  %v1788_v2 = vpop.f32.mrb[75].mxu1 }
 0x17f   : > { %v1893_v5 = vrot.slane %v1788_v2, 4 }
 0x181   : > { %v2115_v6 = vld [vmem:[#allocation2 + $0x28] sm:$0xff]  ;;  %v1894_v8 = vsel %vm1149_vm3, %v1892_v4, %v1893_v5  ;;  %v1896_v11 = vsel %vm1149_vm3, %v1893_v5, %v1895_v3 }
 0x182   : > { %v2131_v12 = vadd.f32 %v4208_v10, %v2115_v6  ;;  %v2117_v13 = vld [vmem:[#allocation2 + $0x38] sm:$0xff]  ;;  %v1936_v14 = vadd.f32 %v1894_v8, %v1840_v7  ;;  %v1937_v15 = vadd.f32 %v1896_v11, %v1841_v9  ;;  %v1897_v10 = vrot.slane %v3453_v53, 4  ;;  %v1846_v53 = vld [vmem:[#allocation2 + $0x70] sm:$0xff] }
 0x183   : > { %v4234_v16 = vpop.f32.mrb[76].mxu0  ;;  %v2133_v17 = vadd.f32 %v3474_v28, %v2117_v13  ;;  %v2116_v18 = vld [vmem:[#allocation2 + $0x30] sm:$0xff]  ;;  %v3456_v19 = vpop.f32.mrb[76].mxu1 }
 0x184   : > { %v4236_v20 = vpop.f32.mrb[77].mxu0  ;;  %2147 = vst.msk [vmem:[#allocation2 + $0x28] sm:$0xff] %vm387_vm2, %v2131_v12  ;;  %v2132_v21 = vadd.f32 %v2116_v18, %v2055_v39  ;;  %1952 = vst.msk [vmem:[#allocation2 + $0x40] sm:$0xff] %vm387_vm2, %v1936_v14  ;;  %v1801_v22 = vpop.f32.mrb[77].mxu1  ;;  %v1902_v27 = vrot.slane %v3456_v19, 4 }
 0x185   : > { %1953 = vst.msk [vmem:[#allocation2 + $0x48] sm:$0xff] %vm387_vm2, %v1937_v15  ;;  %v4241_v23 = vpop.f32.mrb[78].mxu0  ;;  %2149 = vst.msk [vmem:[#allocation2 + $0x38] sm:$0xff] %vm387_vm2, %v2133_v17  ;;  %v1898_v24 = vrot.slane %v1801_v22, 4  ;;  %v3457_v25 = vpop.f32.mrb[78].mxu1 }
 0x186   : > { %v2085_v26 = vpop.f32.mrb[79].mxu0  ;;  %2148 = vst.msk [vmem:[#allocation2 + $0x30] sm:$0xff] %vm387_vm2, %v2132_v21  ;;  %v1903_v28 = vrot.slane %v3457_v25, 4  ;;  %v1804_v29 = vpop.f32.mrb[79].mxu1  ;;  %v2292_v25 = vld [vmem:[#allocation2] sm:$0xff] }
 0x187   : > { %v1899_v31 = vsel %vm1149_vm3, %v1897_v10, %v1898_v24  ;;  %v1900_v32 = vrot.slane %v1804_v29, 4  ;;  %v2293_v26 = vld [vmem:[#allocation2 + $0x8] sm:$0xff] }
 0x188   : > { %v1938_v33 = vadd.f32 %v1899_v31, %v1842_v30  ;;  %v1904_v35 = vsel %vm1149_vm3, %v1902_v27, %v1903_v28 }
 0x189   : > { %v1940_v36 = vadd.f32 %v1904_v35, %v1844_v34  ;;  %v1901_v38 = vsel %vm1149_vm3, %v1898_v24, %v1900_v32 }
 0x18a   : > { %1954 = vst.msk [vmem:[#allocation2 + $0x50] sm:$0xff] %vm387_vm2, %v1938_v33  ;;  %v1939_v39 = vadd.f32 %v1901_v38, %v1843_v37 }
 0x18b   : > { %v4249_v40 = vpop.f32.mrb[80].mxu0  ;;  %v2118_v41 = vld [vmem:[#allocation2 + $0x40] sm:$0xff]  ;;  %1956 = vst.msk [vmem:[#allocation2 + $0x60] sm:$0xff] %vm387_vm2, %v1940_v36  ;;  %v3460_v43 = vpop.f32.mrb[80].mxu1 }
 0x18c   : > { %v2119_v42 = vld [vmem:[#allocation2 + $0x48] sm:$0xff]  ;;  %v2097_v44 = vpop.f32.mrb[81].mxu0  ;;  %v2134_v45 = vadd.f32 %v2118_v41, %v2067_v61  ;;  %1955 = vst.msk [vmem:[#allocation2 + $0x58] sm:$0xff] %vm387_vm2, %v1939_v39  ;;  %v1817_v47 = vpop.f32.mrb[81].mxu1  ;;  %v1908_v52 = vrot.slane %v3460_v43, 4 }
 0x18d   : > { %v2135_v46 = vadd.f32 %v2119_v42, %v2070_v1  ;;  %v3487_v48 = vpop.f32.mrb[82].mxu0  ;;  %v1905_v49 = vrot.slane %v1817_v47, 4  ;;  %v3461_v50 = vpop.f32.mrb[82].mxu1 }
 0x18e   : > { %v2099_v51 = vpop.f32.mrb[83].mxu0  ;;  %2150 = vst.msk [vmem:[#allocation2 + $0x40] sm:$0xff] %vm387_vm2, %v2134_v45  ;;  %v1910_v54 = vrot.slane %v3461_v50, 4  ;;  %v1820_v55 = vpop.f32.mrb[83].mxu1 }
 0x18f   : > { %2151 = vst.msk [vmem:[#allocation2 + $0x48] sm:$0xff] %vm387_vm2, %v2135_v46  ;;  %v1906_v57 = vsel %vm1149_vm3, %v1903_v28, %v1905_v49  ;;  %v1907_v58 = vrot.slane %v1820_v55, 4 }
 0x190   : > { %v1941_v59 = vadd.f32 %v1906_v57, %v1845_v56  ;;  %v1911_v61 = vsel %vm1149_vm3, %v1908_v52, %v1910_v54  ;;  %v2294_v54 = vld [vmem:[#allocation2 + $0x10] sm:$0xff] }
 0x191   : > { %v2120_v62 = vld [vmem:[#allocation2 + $0x50] sm:$0xff]  ;;  %v1943_v63 = vadd.f32 %v1911_v61, %v1847_v60  ;;  %v1909_v1 = vsel %vm1149_vm3, %v1907_v58, %v1908_v52 }
 0x192   : > { %v2136_v2 = vadd.f32 %v4227_v0, %v2120_v62  ;;  %v2122_v3 = vld [vmem:[#allocation2 + $0x60] sm:$0xff]  ;;  %1957 = vst.msk [vmem:[#allocation2 + $0x68] sm:$0xff] %vm387_vm2, %v1941_v59  ;;  %v1942_v4 = vadd.f32 %v1909_v1, %v1846_v53 }
 0x193   : > { %v3518_v5 = vpop.f32.mrb[84].mxu0  ;;  %v2138_v6 = vadd.f32 %v4234_v16, %v2122_v3  ;;  %v2121_v7 = vld [vmem:[#allocation2 + $0x58] sm:$0xff]  ;;  %1959 = vst.msk [vmem:[#allocation2 + $0x78] sm:$0xff] %vm387_vm2, %v1943_v63  ;;  %v3492_v9 = vpop.f32.mrb[84].mxu1  ;;  %v2296_v59 = vld [vmem:[#allocation2 + $0x20] sm:$0xff] }
 0x194   : > { %v2459_v8 = vpop.f32.mrb[85].mxu0  ;;  %2152 = vst.msk [vmem:[#allocation2 + $0x50] sm:$0xff] %vm387_vm2, %v2136_v2  ;;  %v2137_v11 = vadd.f32 %v2121_v7, %v4236_v20  ;;  %1958 = vst.msk [vmem:[#allocation2 + $0x70] sm:$0xff] %vm387_vm2, %v1942_v4  ;;  %v2197_v12 = vpop.f32.mrb[85].mxu1  ;;  %v2597_v0 = vrot.slane %v3518_v5, 4  ;;  %v2335_v19 = vrot.slane %v3492_v9, 2 }
 0x195   : > { %v2594_v13 = vrot.slane %v2459_v8, 4  ;;  %v3519_v14 = vpop.f32.mrb[86].mxu0  ;;  %2154 = vst.msk [vmem:[#allocation2 + $0x60] sm:$0xff] %vm387_vm2, %v2138_v6  ;;  %v3493_v15 = vpop.f32.mrb[86].mxu1  ;;  %v2332_v21 = vrot.slane %v2197_v12, 2  ;;  %v2295_v63 = vld [vmem:[#allocation2 + $0x18] sm:$0xff] }
 0x196   : > { %v2462_v17 = vpop.f32.mrb[87].mxu0  ;;  %2153 = vst.msk [vmem:[#allocation2 + $0x58] sm:$0xff] %vm387_vm2, %v2137_v11  ;;  %v2200_v16 = vpop.f32.mrb[87].mxu1  ;;  %v2599_v33 = vrot.slane %v3519_v14, 4  ;;  %v2337_v44 = vrot.slane %v3493_v15, 2 }
 0x197   : > { %v2595_v18 = vrot.slane %v2462_v17, 4  ;;  %v2333_v22 = vrot.slane %v2200_v16, 2 }
 0x199   : > { %v2596_v10 = vsel %vm1149_vm3, %v2594_v13, %v2595_v18  ;;  %v2598_v20 = vsel %vm1149_vm3, %v2595_v18, %v2597_v0  ;;  %v2123_v24 = vld [vmem:[#allocation2 + $0x68] sm:$0xff]  ;;  %v2334_v27 = vsel %vm886_vm4, %v2332_v21, %v2333_v22  ;;  %v2336_v28 = vsel %vm886_vm4, %v2333_v22, %v2335_v19 }
 0x19a   : > { %v2139_v29 = vadd.f32 %v4241_v23, %v2123_v24  ;;  %v2125_v30 = vld [vmem:[#allocation2 + $0x78] sm:$0xff]  ;;  %v2388_v31 = vadd.f32 %v2334_v27, %v2292_v25  ;;  %v2389_v32 = vadd.f32 %v2336_v28, %v2293_v26 }
 0x19b   : > { %v3522_v34 = vpop.f32.mrb[88].mxu0  ;;  %v2141_v35 = vadd.f32 %v4249_v40, %v2125_v30  ;;  %v2124_v36 = vld [vmem:[#allocation2 + $0x70] sm:$0xff]  ;;  %v3496_v37 = vpop.f32.mrb[88].mxu1  ;;  %v2299_v27 = vld [vmem:[#allocation2 + $0x38] sm:$0xff] }
 0x19c   : > { %v2604_v38 = vrot.slane %v3522_v34, 4  ;;  %v2475_v39 = vpop.f32.mrb[89].mxu0  ;;  %2155 = vst.msk [vmem:[#allocation2 + $0x68] sm:$0xff] %vm387_vm2, %v2139_v29  ;;  %v2140_v41 = vadd.f32 %v2124_v36, %v2099_v51  ;;  %2404 = vst.msk [vmem:[#allocation2] sm:$0xff] %vm387_vm2, %v2388_v31  ;;  %v2213_v42 = vpop.f32.mrb[89].mxu1  ;;  %v2342_v48 = vrot.slane %v3496_v37, 2 }
 0x19d   : > { %2405 = vst.msk [vmem:[#allocation2 + $0x8] sm:$0xff] %vm387_vm2, %v2389_v32  ;;  %v2600_v23 = vrot.slane %v2475_v39, 4  ;;  %v3523_v43 = vpop.f32.mrb[90].mxu0  ;;  %2157 = vst.msk [vmem:[#allocation2 + $0x78] sm:$0xff] %vm387_vm2, %v2141_v35  ;;  %v2338_v45 = vrot.slane %v2213_v42, 2  ;;  %v3497_v46 = vpop.f32.mrb[90].mxu1 }
 0x19e   : > { %v2605_v40 = vrot.slane %v3523_v43, 4  ;;  %v2478_v47 = vpop.f32.mrb[91].mxu0  ;;  %2156 = vst.msk [vmem:[#allocation2 + $0x70] sm:$0xff] %vm387_vm2, %v2140_v41  ;;  %v2343_v49 = vrot.slane %v3497_v46, 2  ;;  %v2216_v51 = vpop.f32.mrb[91].mxu1  ;;  %v2298_v32 = vld [vmem:[#allocation2 + $0x30] sm:$0xff] }
 0x19f   : > { %v2601_v50 = vsel %vm1149_vm3, %v2599_v33, %v2600_v23  ;;  %v2602_v52 = vrot.slane %v2478_v47, 4  ;;  %v2339_v55 = vsel %vm886_vm4, %v2337_v44, %v2338_v45  ;;  %v2340_v56 = vrot.slane %v2216_v51, 2 }
 0x1a0   : > { %v2606_v57 = vsel %vm1149_vm3, %v2604_v38, %v2605_v40  ;;  %v2390_v58 = vadd.f32 %v2339_v55, %v2294_v54  ;;  %v2344_v60 = vsel %vm886_vm4, %v2342_v48, %v2343_v49  ;;  %v4301_v38 = vld [vmem:[%s4545_s3] ss:$0 sm:$0xff] }
 0x1a1   : > { %v2603_v61 = vsel %vm1149_vm3, %v2600_v23, %v2602_v52  ;;  %v2392_v62 = vadd.f32 %v2344_v60, %v2296_v59  ;;  %v2341_v53 = vsel %vm886_vm4, %v2338_v45, %v2340_v56 }
 0x1a2   : > { %2406 = vst.msk [vmem:[#allocation2 + $0x10] sm:$0xff] %vm387_vm2, %v2390_v58  ;;  %v2391_v1 = vadd.f32 %v2341_v53, %v2295_v63 }
 0x1a3   : > { %v3526_v2 = vpop.f32.mrb[92].mxu0  ;;  %v2554_v3 = vld [vmem:[#allocation2] sm:$0xff]  ;;  %2408 = vst.msk [vmem:[#allocation2 + $0x20] sm:$0xff] %vm387_vm2, %v2392_v62  ;;  %v3500_v5 = vpop.f32.mrb[92].mxu1 }
 0x1a4   : > { %v2555_v4 = vld [vmem:[#allocation2 + $0x8] sm:$0xff]  ;;  %v2610_v6 = vrot.slane %v3526_v2, 4  ;;  %v2491_v7 = vpop.f32.mrb[93].mxu0  ;;  %v2650_v9 = vadd.f32 %v2596_v10, %v2554_v3  ;;  %2407 = vst.msk [vmem:[#allocation2 + $0x18] sm:$0xff] %vm387_vm2, %v2391_v1  ;;  %v2229_v11 = vpop.f32.mrb[93].mxu1  ;;  %v2348_v16 = vrot.slane %v3500_v5, 2 }
 0x1a5   : > { %v2651_v8 = vadd.f32 %v2598_v20, %v2555_v4  ;;  %v2607_v12 = vrot.slane %v2491_v7, 4  ;;  %v3527_v0 = vpop.f32.mrb[94].mxu0  ;;  %v2345_v13 = vrot.slane %v2229_v11, 2  ;;  %v3501_v14 = vpop.f32.mrb[94].mxu1  ;;  %v2297_v10 = vld [vmem:[#allocation2 + $0x28] sm:$0xff]  ;;  %v2300_v1 = vld [vmem:[#allocation2 + $0x40] sm:$0xff] }
 0x1a6   : > { %v2612_v15 = vrot.slane %v3527_v0, 4  ;;  %v2494_v17 = vpop.f32.mrb[95].mxu0  ;;  %2666 = vst.msk [vmem:[#allocation2] sm:$0xff] %vm387_vm2, %v2650_v9  ;;  %v2350_v18 = vrot.slane %v3501_v14, 2  ;;  %v2232_v21 = vpop.f32.mrb[95].mxu1  ;;  %v2301_v2 = vld [vmem:[#allocation2 + $0x48] sm:$0xff] }
 0x1a7   : > { %2667 = vst.msk [vmem:[#allocation2 + $0x8] sm:$0xff] %vm387_vm2, %v2651_v8  ;;  %v2608_v19 = vsel %vm1149_vm3, %v2605_v40, %v2607_v12  ;;  %v2609_v22 = vrot.slane %v2494_v17, 4  ;;  %v2346_v20 = vsel %vm886_vm4, %v2343_v49, %v2345_v13  ;;  %v2347_v24 = vrot.slane %v2232_v21, 2  ;;  %v4311_v49 = vld [vmem:[%s4546_s4] ss:$0 sm:$0xff] }
 0x1a8   : > { %v2613_v25 = vsel %vm1149_vm3, %v2610_v6, %v2612_v15  ;;  %v2393_v26 = vadd.f32 %v2346_v20, %v2297_v10  ;;  %v2351_v28 = vsel %vm886_vm4, %v2348_v16, %v2350_v18 }
 0x1a9   : > { %v4294_v29 = vsel %vm1149_vm3, %v2609_v22, %v2610_v6  ;;  %v2556_v30 = vld [vmem:[#allocation2 + $0x10] sm:$0xff]  ;;  %v2395_v31 = vadd.f32 %v2351_v28, %v2299_v27  ;;  %v2349_v33 = vsel %vm886_vm4, %v2347_v24, %v2348_v16 }
 0x1aa   : > { %v2652_v34 = vadd.f32 %v2601_v50, %v2556_v30  ;;  %v2558_v35 = vld [vmem:[#allocation2 + $0x20] sm:$0xff]  ;;  %2409 = vst.msk [vmem:[#allocation2 + $0x28] sm:$0xff] %vm387_vm2, %v2393_v26  ;;  %v2394_v36 = vadd.f32 %v2349_v33, %v2298_v32 }
 0x1ab   : > { %v3530_v37 = vpop.f32.mrb[96].mxu0  ;;  %v2654_v39 = vadd.f32 %v2606_v57, %v2558_v35  ;;  %v2557_v41 = vld [vmem:[#allocation2 + $0x18] sm:$0xff]  ;;  %2411 = vst.msk [vmem:[#allocation2 + $0x38] sm:$0xff] %vm387_vm2, %v2395_v31  ;;  %v3504_v42 = vpop.f32.mrb[96].mxu1 }
 0x1ac   : > { %v2507_v23 = vpop.f32.mrb[97].mxu0  ;;  %2668 = vst.msk [vmem:[#allocation2 + $0x10] sm:$0xff] %vm387_vm2, %v2652_v34  ;;  %v2653_v43 = vadd.f32 %v2603_v61, %v2557_v41  ;;  %2410 = vst.msk [vmem:[#allocation2 + $0x30] sm:$0xff] %vm387_vm2, %v2394_v36  ;;  %v2245_v44 = vpop.f32.mrb[97].mxu1  ;;  %v2617_v45 = vrot.slane %v3530_v37, 4  ;;  %v2355_v57 = vrot.slane %v3504_v42, 2 }
 0x1ad   : > { %v2614_v46 = vrot.slane %v2507_v23, 4  ;;  %v4306_v40 = vpop.f32.mrb[98].mxu0  ;;  %v2685_v47 = vld [vmem:[#allocation2] sm:$0xff]  ;;  %2670 = vst.msk [vmem:[#allocation2 + $0x20] sm:$0xff] %vm387_vm2, %v2654_v39  ;;  %v4314_v50 = vpop.f32.mrb[98].mxu1  ;;  %v2352_v58 = vrot.slane %v2245_v44, 2 }
 0x1ae   : > { %v2686_v48 = vld [vmem:[#allocation2 + $0x8] sm:$0xff]  ;;  %v2510_v51 = vpop.f32.mrb[99].mxu0  ;;  %v2708_v52 = vmul.f32 %v4301_v38, %v2685_v47  ;;  %2669 = vst.msk [vmem:[#allocation2 + $0x18] sm:$0xff] %vm387_vm2, %v2653_v43  ;;  %v2248_v55 = vpop.f32.mrb[99].mxu1  ;;  %v2619_v5 = vrot.slane %v4306_v40, 4  ;;  %v2357_v14 = vrot.slane %v4314_v50, 2 }
 0x1af   : > { %v2709_v54 = vmul.f32 %v4301_v38, %v2686_v48  ;;  %v2615_v56 = vrot.slane %v2510_v51, 4  ;;  %v2353_v59 = vrot.slane %v2248_v55, 2  ;;  %v2302_v39 = vld [vmem:[#allocation2 + $0x50] sm:$0xff]  ;;  %v2303_v50 = vld [vmem:[#allocation2 + $0x58] sm:$0xff] }
 0x1b0   : > { %v4320_v60 = vadd.f32 %v4311_v49, %v2708_v52 }
 0x1b1   : > { %v4323_v61 = vadd.f32 %v4311_v49, %v2709_v54  ;;  %v4326_v62 = vsel %vm1149_vm3, %v2614_v46, %v2615_v56  ;;  %v4329_v63 = vsel %vm1149_vm3, %v2615_v56, %v2617_v45  ;;  %v2559_v53 = vld [vmem:[#allocation2 + $0x28] sm:$0xff]  ;;  %v2354_v3 = vsel %vm886_vm4, %v2352_v58, %v2353_v59  ;;  %v2304_v46 = vld [vmem:[#allocation2 + $0x60] sm:$0xff] }
 0x1b2   : > { %v2356_v4 = vsel %vm886_vm4, %v2353_v59, %v2355_v57  ;;  %v3165_v6 = vmul.f32 -1.442695, %v4320_v60  ;;  %v2655_v9 = vadd.f32 %v2608_v19, %v2559_v53  ;;  %v2561_v8 = vld [vmem:[#allocation2 + $0x38] sm:$0xff]  ;;  %v2396_v11 = vadd.f32 %v2354_v3, %v2300_v1 }
 0x1b3   : > { %v3166_v7 = vmul.f32 -1.442695, %v4323_v61  ;;  %v3534_v12 = vpop.f32.mrb[100].mxu0  ;;  %v2687_v0 = vld [vmem:[#allocation2 + $0x10] sm:$0xff]  ;;  %v2657_v13 = vadd.f32 %v2613_v25, %v2561_v8  ;;  %v2397_v17 = vadd.f32 %v2356_v4, %v2301_v2  ;;  %v3508_v16 = vpop.f32.mrb[100].mxu1 }
 0x1b4   : > { %v2560_v15 = vld [vmem:[#allocation2 + $0x30] sm:$0xff]  ;;  %v2624_v18 = vrot.slane %v3534_v12, 4  ;;  %v4337_v21 = vpop.f32.mrb[101].mxu0  ;;  %3612 = vpow2.f32 %v3165_v6  ;;  %v2710_v22 = vmul.f32 %v4301_v38, %v2687_v0  ;;  %v2689_v10 = vld [vmem:[#allocation2 + $0x20] sm:$0xff]  ;;  %2671 = vst.msk [vmem:[#allocation2 + $0x28] sm:$0xff] %vm387_vm2, %v2655_v9  ;;  %2412 = vst.msk [vmem:[#allocation2 + $0x40] sm:$0xff] %vm387_vm2, %v2396_v11 }
 0x1b5   : > { %v2656_v19 = vadd.f32 %v4294_v29, %v2560_v15  ;;  %v2362_v20 = vrot.slane %v3508_v16, 2  ;;  %v2261_v24 = vpop.f32.mrb[101].mxu1  ;;  %v4343_v25 = vpop.f32.mrb[102].mxu0  ;;  %3614 = vpow2.f32 %v3166_v7  ;;  %v2712_v26 = vmul.f32 %v4301_v38, %v2689_v10  ;;  %v2688_v27 = vld [vmem:[#allocation2 + $0x18] sm:$0xff]  ;;  %2673 = vst.msk [vmem:[#allocation2 + $0x38] sm:$0xff] %vm387_vm2, %v2657_v13  ;;  %2413 = vst.msk [vmem:[#allocation2 + $0x48] sm:$0xff] %vm387_vm2, %v2397_v17 }
 0x1b6   : > { %v2358_v28 = vrot.slane %v2261_v24, 2  ;;  %v4348_v30 = vpop.f32.mrb[102].mxu1  ;;  %v2620_v29 = vrot.slane %v4337_v21, 4  ;;  %v2526_v31 = vpop.f32.mrb[103].mxu0  ;;  %v4352_v32 = vadd.f32 %v4311_v49, %v2710_v22  ;;  %v2711_v33 = vmul.f32 %v4301_v38, %v2688_v27  ;;  %v2305_v24 = vld [vmem:[#allocation2 + $0x68] sm:$0xff] }
 0x1b7   : > { %2672 = vst.msk [vmem:[#allocation2 + $0x30] sm:$0xff] %vm387_vm2, %v2656_v19  ;;  %v2363_v34 = vrot.slane %v4348_v30, 2  ;;  %v2264_v35 = vpop.f32.mrb[103].mxu1  ;;  %v2625_v36 = vrot.slane %v4343_v25, 4  ;;  %v4360_v37 = vadd.f32 %v4311_v49, %v2712_v26  ;;  %v2622_v56 = vrot.slane %v2526_v31, 4 }
 0x1b8   : > { %v2359_v41 = vsel %vm886_vm4, %v2357_v14, %v2358_v28  ;;  %v4364_v42 = vsel %vm1149_vm3, %v2619_v5, %v2620_v29  ;;  %v2360_v23 = vrot.slane %v2264_v35, 2  ;;  %v3167_v43 = vmul.f32 -1.442695, %v4352_v32 }
 0x1b9   : > { %v4368_v44 = vadd.f32 %v4311_v49, %v2711_v33  ;;  %v2398_v45 = vadd.f32 %v2359_v41, %v2302_v39  ;;  %v2364_v40 = vsel %vm886_vm4, %v2362_v20, %v2363_v34  ;;  %v3169_v47 = vmul.f32 -1.442695, %v4360_v37  ;;  %v2307_v41 = vld [vmem:[#allocation2 + $0x78] sm:$0xff] }
 0x1ba   : > { %v2400_v48 = vadd.f32 %v2364_v40, %v2304_v46  ;;  %v2361_v51 = vsel %vm886_vm4, %v2358_v28, %v2360_v23  ;;  %v4378_v52 = vsel %vm1149_vm3, %v2624_v18, %v2625_v36  ;;  %3616 = vpow2.f32 %v3167_v43 }
 0x1bb   : > { %v3168_v54 = vmul.f32 -1.442695, %v4368_v44  ;;  %2414 = vst.msk [vmem:[#allocation2 + $0x50] sm:$0xff] %vm387_vm2, %v2398_v45  ;;  %v2399_v55 = vadd.f32 %v2361_v51, %v2303_v50  ;;  %v4388_v57 = vpop.f32.mrb[104].mxu0  ;;  %3618 = vpow2.f32 %v3169_v47  ;;  %v2690_v58 = vld [vmem:[#allocation2 + $0x28] sm:$0xff]  ;;  %v2562_v59 = vld [vmem:[#allocation2 + $0x40] sm:$0xff]  ;;  %v2623_v13 = vsel %vm1149_vm3, %v2620_v29, %v2622_v56 }
 0x1bc   : > { %2416 = vst.msk [vmem:[#allocation2 + $0x60] sm:$0xff] %vm387_vm2, %v2400_v48  ;;  %v3512_v53 = vpop.f32.mrb[104].mxu1  ;;  %v2630_v1 = vrot.slane %v4388_v57, 4  ;;  %v2539_v2 = vpop.f32.mrb[105].mxu0  ;;  %v2713_v3 = vmul.f32 %v4301_v38, %v2690_v58  ;;  %v2692_v4 = vld [vmem:[#allocation2 + $0x38] sm:$0xff]  ;;  %v2563_v5 = vld [vmem:[#allocation2 + $0x48] sm:$0xff]  ;;  %v2658_v6 = vadd.f32 %v4326_v62, %v2562_v59 }
 0x1bd   : > { %3620 = vpow2.f32 %v3168_v54  ;;  %2415 = vst.msk [vmem:[#allocation2 + $0x58] sm:$0xff] %vm387_vm2, %v2399_v55  ;;  %v2368_v7 = vrot.slane %v3512_v53, 2  ;;  %v2277_v9 = vpop.f32.mrb[105].mxu1  ;;  %v3539_v8 = vpop.f32.mrb[106].mxu0  ;;  %v2715_v11 = vmul.f32 %v4301_v38, %v2692_v4  ;;  %v2659_v0 = vadd.f32 %v4329_v63, %v2563_v5  ;;  %v2306_v48 = vld [vmem:[#allocation2 + $0x70] sm:$0xff] }
 0x1be   : > { %v2691_v12 = vld [vmem:[#allocation2 + $0x30] sm:$0xff]  ;;  %v2365_v14 = vrot.slane %v2277_v9, 2  ;;  %v3513_v15 = vpop.f32.mrb[106].mxu1  ;;  %v2542_v17 = vpop.f32.mrb[107].mxu0  ;;  %v4405_v62 = vadd.f32 %v4311_v49, %v2713_v3  ;;  %2674 = vst.msk [vmem:[#allocation2 + $0x40] sm:$0xff] %vm387_vm2, %v2658_v6  ;;  %v2627_v22 = vrot.slane %v2539_v2, 4 }
 0x1bf   : > { %v3613_v16 = vpop.eup %3612  ;;  %v2714_v18 = vmul.f32 %v4301_v38, %v2691_v12  ;;  %v2370_v21 = vrot.slane %v3513_v15, 2  ;;  %v2280_v63 = vpop.f32.mrb[107].mxu1  ;;  %v4410_v20 = vadd.f32 %v4311_v49, %v2715_v11  ;;  %2675 = vst.msk [vmem:[#allocation2 + $0x48] sm:$0xff] %vm387_vm2, %v2659_v0  ;;  %v2632_v50 = vrot.slane %v3539_v8, 4 }
 0x1c0   : > { %v3615_v10 = vpop.eup %3614  ;;  %v2795_v19 = vadd.f32 1.0, %v3613_v16  ;;  %v2366_v26 = vsel %vm886_vm4, %v2363_v34, %v2365_v14  ;;  %v2367_v27 = vrot.slane %v2280_v63, 2  ;;  %v3170_v29 = vmul.f32 -1.442695, %v4405_v62 }
 0x1c1   : > { %v2796_v28 = vadd.f32 1.0, %v3615_v10  ;;  %v4418_v31 = vadd.f32 %v4311_v49, %v2714_v18  ;;  %v2401_v33 = vadd.f32 %v2366_v26, %v2305_v24  ;;  %v3172_v35 = vmul.f32 -1.442695, %v4410_v20 }
 0x1c2   : > { %3622 = vrcp.f32 %v2795_v19  ;;  %v2564_v39 = vld [vmem:[#allocation2 + $0x50] sm:$0xff]  ;;  %v2371_v23 = vsel %vm886_vm4, %v2368_v7, %v2370_v21  ;;  %v2628_v30 = vsel %vm1149_vm3, %v2625_v36, %v2627_v22  ;;  %v2369_v25 = vsel %vm886_vm4, %v2367_v27, %v2368_v7 }
 0x1c3   : > { %3624 = vrcp.f32 %v2796_v28  ;;  %v3171_v34 = vmul.f32 -1.442695, %v4418_v31  ;;  %v2660_v43 = vadd.f32 %v4364_v42, %v2564_v39  ;;  %v2566_v45 = vld [vmem:[#allocation2 + $0x60] sm:$0xff]  ;;  %2417 = vst.msk [vmem:[#allocation2 + $0x68] sm:$0xff] %vm387_vm2, %v2401_v33  ;;  %v2403_v46 = vadd.f32 %v2371_v23, %v2307_v41 }
 0x1c4   : > { %3626 = vpow2.f32 %v3170_v29  ;;  %v2662_v40 = vadd.f32 %v4378_v52, %v2566_v45  ;;  %v2565_v47 = vld [vmem:[#allocation2 + $0x58] sm:$0xff]  ;;  %v3617_v36 = vpop.eup %3616  ;;  %v2402_v42 = vadd.f32 %v2369_v25, %v2306_v48  ;;  %v2629_v54 = vrot.slane %v2542_v17, 4 }
 0x1c5   : > { %3628 = vpow2.f32 %v3172_v35  ;;  %2676 = vst.msk [vmem:[#allocation2 + $0x50] sm:$0xff] %vm387_vm2, %v2660_v43  ;;  %v2661_v51 = vadd.f32 %v2623_v13, %v2565_v47  ;;  %2419 = vst.msk [vmem:[#allocation2 + $0x78] sm:$0xff] %vm387_vm2, %v2403_v46  ;;  %v3619_v55 = vpop.eup %3618  ;;  %v2797_v56 = vadd.f32 1.0, %v3617_v36  ;;  %v2693_v58 = vld [vmem:[#allocation2 + $0x40] sm:$0xff]  ;;  %v2633_v52 = vsel %vm1149_vm3, %v2630_v1, %v2632_v50 }
 0x1c6   : > { %3630 = vpow2.f32 %v3171_v34  ;;  %2678 = vst.msk [vmem:[#allocation2 + $0x60] sm:$0xff] %vm387_vm2, %v2662_v40  ;;  %v2799_v53 = vadd.f32 1.0, %v3619_v55  ;;  %v2694_v2 = vld [vmem:[#allocation2 + $0x48] sm:$0xff]  ;;  %v2716_v3 = vmul.f32 %v4301_v38, %v2693_v58  ;;  %2418 = vst.msk [vmem:[#allocation2 + $0x70] sm:$0xff] %vm387_vm2, %v2402_v42  ;;  %v2631_v4 = vsel %vm1149_vm3, %v2629_v54, %v2630_v1 }
 0x1c7   : > { %v3621_v59 = vpop.eup %3620  ;;  %2677 = vst.msk [vmem:[#allocation2 + $0x58] sm:$0xff] %vm387_vm2, %v2661_v51  ;;  %3632 = vrcp.f32 %v2797_v56  ;;  %v2717_v6 = vmul.f32 %v4301_v38, %v2694_v2 }
 0x1c8   : > { %v2798_v5 = vadd.f32 1.0, %v3621_v59  ;;  %3634 = vrcp.f32 %v2799_v53  ;;  %v4446_v7 = vadd.f32 %v4311_v49, %v2716_v3 }
 0x1c9   : > { %v4449_v9 = vadd.f32 %v4311_v49, %v2717_v6 }
 0x1ca   : > { %3636 = vrcp.f32 %v2798_v5  ;;  %v2567_v8 = vld [vmem:[#allocation2 + $0x68] sm:$0xff]  ;;  %v3173_v11 = vmul.f32 -1.442695, %v4446_v7 }
 0x1cb   : > { %v2663_v12 = vadd.f32 %v2628_v30, %v2567_v8  ;;  %v3174_v1 = vmul.f32 -1.442695, %v4449_v9 }
 0x1cc   : > { %v3623_v57 = vpop.eup %3622  ;;  %v2695_v0 = vld [vmem:[#allocation2 + $0x50] sm:$0xff]  ;;  %v2569_v13 = vld [vmem:[#allocation2 + $0x78] sm:$0xff]  ;;  %3638 = vpow2.f32 %v3173_v11 }
 0x1cd   : > { %v3625_v14 = vpop.eup %3624  ;;  %v2843_v15 = vmul.f32 %v3623_v57, %v4320_v60  ;;  %v2718_v17 = vmul.f32 %v4301_v38, %v2695_v0  ;;  %v2697_v16 = vld [vmem:[#allocation2 + $0x60] sm:$0xff]  ;;  %2679 = vst.msk [vmem:[#allocation2 + $0x68] sm:$0xff] %vm387_vm2, %v2663_v12  ;;  %v2665_v18 = vadd.f32 %v2633_v52, %v2569_v13  ;;  %3640 = vpow2.f32 %v3174_v1  ;;  %v2568_v19 = vld [vmem:[#allocation2 + $0x70] sm:$0xff] }
 0x1ce   : > { %v3627_v21 = vpop.eup %3626  ;;  %v2844_v22 = vmul.f32 %v3625_v14, %v4323_v61  ;;  %v2720_v63 = vmul.f32 %v4301_v38, %v2697_v16  ;;  %v2696_v10 = vld [vmem:[#allocation2 + $0x58] sm:$0xff]  ;;  %v2664_v28 = vadd.f32 %v2631_v4, %v2568_v19 }
 0x1cf   : > { %v3629_v24 = vpop.eup %3628  ;;  %2859 = vst.msk [vmem:[%s4455_s6] sm:$0xff] %vm387_vm2, %v2843_v15  ;;  %v2800_v60 = vadd.f32 1.0, %v3627_v21  ;;  %v4466_v26 = vadd.f32 %v4311_v49, %v2718_v17  ;;  %v2719_v27 = vmul.f32 %v4301_v38, %v2696_v10  ;;  %2681 = vst.msk [vmem:[#allocation2 + $0x78] sm:$0xff] %vm387_vm2, %v2665_v18 }
 0x1d0   : > { %v3631_v29 = vpop.eup %3630  ;;  %2860 = vst.msk [vmem:[%s4455_s6 + $0x8] sm:$0xff] %vm387_vm2, %v2844_v22  ;;  %v2802_v61 = vadd.f32 1.0, %v3629_v24  ;;  %v4473_v33 = vadd.f32 %v4311_v49, %v2720_v63  ;;  %2680 = vst.msk [vmem:[#allocation2 + $0x70] sm:$0xff] %vm387_vm2, %v2664_v28 }
 0x1d1   : > { %3642 = vrcp.f32 %v2800_v60  ;;  %v2801_v35 = vadd.f32 1.0, %v3631_v29  ;;  %v3175_v39 = vmul.f32 -1.442695, %v4466_v26  ;;  %v4477_v41 = vadd.f32 %v4311_v49, %v2719_v27  ;;  %v3633_v23 = vpop.eup %3632 }
 0x1d2   : > { %3644 = vrcp.f32 %v2802_v61  ;;  %v3177_v30 = vmul.f32 -1.442695, %v4473_v33  ;;  %v3635_v34 = vpop.eup %3634  ;;  %v2845_v43 = vmul.f32 %v3633_v23, %v4352_v32 }
 0x1d3   : > { %3646 = vrcp.f32 %v2801_v35  ;;  %v3176_v45 = vmul.f32 -1.442695, %v4477_v41  ;;  %v2847_v40 = vmul.f32 %v3635_v34, %v4360_v37 }
 0x1d4   : > { %v3637_v46 = vpop.eup %3636  ;;  %3648 = vpow2.f32 %v3175_v39  ;;  %v2698_v47 = vld [vmem:[#allocation2 + $0x68] sm:$0xff]  ;;  %2861 = vst.msk [vmem:[%s4455_s6 + $0x10] sm:$0xff] %vm387_vm2, %v2845_v43 }
 0x1d5   : > { %v2846_v48 = vmul.f32 %v3637_v46, %v4368_v44  ;;  %3650 = vpow2.f32 %v3177_v30  ;;  %v2721_v25 = vmul.f32 %v4301_v38, %v2698_v47  ;;  %2863 = vst.msk [vmem:[%s4455_s6 + $0x20] sm:$0xff] %vm387_vm2, %v2847_v40 }
 0x1d6   : > { %3652 = vpow2.f32 %v3176_v45  ;;  %v2700_v50 = vld [vmem:[#allocation2 + $0x78] sm:$0xff]  ;;  %v3639_v32 = vpop.eup %3638 }
 0x1d7   : > { %2862 = vst.msk [vmem:[%s4455_s6 + $0x18] sm:$0xff] %vm387_vm2, %v2846_v48  ;;  %v2744_v36 = vadd.f32 %v4311_v49, %v2721_v25  ;;  %v2723_v37 = vmul.f32 %v4301_v38, %v2700_v50  ;;  %v3641_v51 = vpop.eup %3640  ;;  %v2803_v42 = vadd.f32 1.0, %v3639_v32  ;;  %v2699_v54 = vld [vmem:[#allocation2 + $0x70] sm:$0xff] }
 0x1d8   : > { %v2804_v55 = vadd.f32 1.0, %v3641_v51  ;;  %v2722_v58 = vmul.f32 %v4301_v38, %v2699_v54 }
 0x1d9   : > { %v3178_v56 = vmul.f32 -1.442695, %v2744_v36  ;;  %v2746_v44 = vadd.f32 %v4311_v49, %v2723_v37  ;;  %3654 = vrcp.f32 %v2803_v42 }
 0x1da   : > { %3656 = vrcp.f32 %v2804_v55  ;;  %v2745_v53 = vadd.f32 %v4311_v49, %v2722_v58 }
 0x1db   : > { %v3643_v52 = vpop.eup %3642  ;;  %v3180_v59 = vmul.f32 -1.442695, %v2746_v44  ;;  %3658 = vpow2.f32 %v3178_v56 }
 0x1dc   : > { %v3645_v2 = vpop.eup %3644  ;;  %v2848_v3 = vmul.f32 %v3643_v52, %v4405_v62  ;;  %v3179_v6 = vmul.f32 -1.442695, %v2745_v53 }
 0x1dd   : > { %v3647_v4 = vpop.eup %3646  ;;  %v2850_v5 = vmul.f32 %v3645_v2, %v4410_v20  ;;  %3660 = vpow2.f32 %v3180_v59 }
 0x1de   : > { %v3649_v8 = vpop.eup %3648  ;;  %2864 = vst.msk [vmem:[%s4455_s6 + $0x28] sm:$0xff] %vm387_vm2, %v2848_v3  ;;  %v2849_v38 = vmul.f32 %v3647_v4, %v4418_v31  ;;  %3662 = vpow2.f32 %v3179_v6 }
 0x1df   : > { %v3651_v11 = vpop.eup %3650  ;;  %2866 = vst.msk [vmem:[%s4455_s6 + $0x38] sm:$0xff] %vm387_vm2, %v2850_v5  ;;  %v2805_v49 = vadd.f32 1.0, %v3649_v8 }
 0x1e0   : > { %v3653_v12 = vpop.eup %3652  ;;  %2865 = vst.msk [vmem:[%s4455_s6 + $0x30] sm:$0xff] %vm387_vm2, %v2849_v38  ;;  %v2807_v62 = vadd.f32 1.0, %v3651_v11 }
 0x1e1   : > { %3664 = vrcp.f32 %v2805_v49  ;;  %v2806_v20 = vadd.f32 1.0, %v3653_v12 }
 0x1e2   : > { %3666 = vrcp.f32 %v2807_v62 }
 0x1e3   : > { %3668 = vrcp.f32 %v2806_v20  ;;  %v3655_v57 = vpop.eup %3654 }
 0x1e4   : > { %v3657_v1 = vpop.eup %3656  ;;  %v2851_v0 = vmul.f32 %v3655_v57, %v4446_v7 }
 0x1e5   : > { %v3659_v31 = vpop.eup %3658  ;;  %v2852_v13 = vmul.f32 %v3657_v1, %v4449_v9 }
 0x1e6   : > { %2867 = vst.msk [vmem:[%s4455_s6 + $0x40] sm:$0xff] %vm387_vm2, %v2851_v0  ;;  %v2808_v15 = vadd.f32 1.0, %v3659_v31 }
 0x1e7   : > { %v3661_v14 = vpop.eup %3660  ;;  %2868 = vst.msk [vmem:[%s4455_s6 + $0x48] sm:$0xff] %vm387_vm2, %v2852_v13 }
 0x1e8   : > { %v2810_v17 = vadd.f32 1.0, %v3661_v14  ;;  %v3663_v16 = vpop.eup %3662  ;;  %3670 = vrcp.f32 %v2808_v15 }
 0x1e9   : > { %v2809_v18 = vadd.f32 1.0, %v3663_v16 }
 0x1ea   : > { %3672 = vrcp.f32 %v2810_v17 }
 0x1eb   : > { %v3665_v21 = vpop.eup %3664  ;;  %3674 = vrcp.f32 %v2809_v18 }
 0x1ec   : > { %v3667_v7 = vpop.eup %3666  ;;  %v2853_v9 = vmul.f32 %v3665_v21, %v4466_v26 }
 0x1ed   : > { %v3669_v22 = vpop.eup %3668  ;;  %v2855_v63 = vmul.f32 %v3667_v7, %v4473_v33 }
 0x1ee   : > { %2869 = vst.msk [vmem:[%s4455_s6 + $0x50] sm:$0xff] %vm387_vm2, %v2853_v9  ;;  %v2854_v10 = vmul.f32 %v3669_v22, %v4477_v41 }
 0x1ef   : > { %2871 = vst.msk [vmem:[%s4455_s6 + $0x60] sm:$0xff] %vm387_vm2, %v2855_v63 }
 0x1f0   : > { %2870 = vst.msk [vmem:[%s4455_s6 + $0x58] sm:$0xff] %vm387_vm2, %v2854_v10 }
 0x1f2   : > { %v3671_v19 = vpop.eup %3670 }
 0x1f3   : > { %v2856_v60 = vmul.f32 %v3671_v19, %v2744_v36 }
 0x1f4   : > { %v3673_v24 = vpop.eup %3672 }
 0x1f5   : > { %v2858_v27 = vmul.f32 %v3673_v24, %v2746_v44  ;;  %v3675_v28 = vpop.eup %3674  ;;  %2872 = vst.msk [vmem:[%s4455_s6 + $0x68] sm:$0xff] %vm387_vm2, %v2856_v60 }
 0x1f6   : > { %v2857_v26 = vmul.f32 %v3675_v28, %v2745_v53 }
 0x1f7   : > { %2874 = vst.msk [vmem:[%s4455_s6 + $0x78] sm:$0xff] %vm387_vm2, %v2858_v27 }
 0x1f8   : > { %2873 = vst.msk [vmem:[%s4455_s6 + $0x70] sm:$0xff] %vm387_vm2, %v2857_v26 }
 0x1f9 PF: > { %s15_s22 = sadd.s32 1, %s3714_s22   ;;  %s4549_s18 = smov %s3706_s20 }
 0x1fa   : > { %p12_p9 = scmp.ge.s32.totalorder %s15_s22, 6   ;;  %s4550_s19 = smov %s3710_s21 }
 0x1fb   : > { %s4551_s20 = smov %s4554_s23  ;;  %s4552_s21 = smov %s4558_s24 }
 0x1fc   :  { %14 = sbr.rel (!%p12_p9) target bundleno = 3 (0x3), region = 92 }

</bundles_post_ra>
